<compile_context>
chip_gen: v7x
topology: tpu7x:2x2x1
jax: 0.10.0
libtpu: 0.0.40
codegen_flags: <defaults>
</compile_context>

<pallas_src>
import math
import jax
import jax.numpy as jnp
from jax.experimental import pallas as pl
from jax.experimental.pallas import tpu as pltpu


def _prefer_tile():
    """Query-tile target: 128 fills the v5e MXU; 256 for v6e / v7x."""
    try:
        kind = jax.devices()[0].device_kind.lower()
        if "v5 lite" in kind or "v5e" in kind or "v5lite" in kind:
            return 128
    except Exception:
        pass
    return 256


def _choose_q_tile(Lp, prefer):
    if Lp <= prefer:
        return Lp                      # full-dim block is always legal
    for tl in (prefer, 256, 128, 64, 32, 16, 8):
        if Lp % tl == 0:
            return tl
    return Lp


def _choose_head_chunk(H, TL, Lp):
    """Keep each live (Hc, TL, Lp) f32 score tensor to roughly <= 4 MiB."""
    budget_elems = (4 * 1024 * 1024) // 4
    hc = max(1, budget_elems // max(1, TL * Lp))
    hc = min(hc, H)
    while H % hc != 0:
        hc -= 1
    return hc


def _choose_ffn_chunk(F):
    if F <= 2048:
        return F
    for c in (2048, 1024, 512, 256, 128):
        if F % c == 0:
            return c
    return F


def _vmem_limit_bytes(Lp, TL, E, H, Hc, FC):
    """Working-set estimate with headroom, clamped to a generation-aware cap."""
    hd = E // H
    bf, f4 = 2, 4
    rnd = lambda v, m: ((v + m - 1) // m) * m
    weights = (E * E + E * 2 * E + E * E + E * 4 * E + 4 * E * E) * bf   # single-buffered bf16
    small = 16 * max(E, 128) * f4                                         # LN params + biases
    io = (Lp * E + 4 * TL * E) * f4                                       # x_full (1x) + x_q/out (2x)
    k_bytes = H * rnd(hd, 16) * rnd(Lp, 128) * bf                         # K^T scratch
    v_bytes = H * rnd(Lp, 16) * max(128, rnd(hd, 128)) * bf               # V scratch (lane pad)
    step = (2 * Hc * TL * rnd(Lp, 128) + 8 * TL * E + TL * FC) * f4       # per-step live temps
    build = Lp * E * bf + Lp * 2 * E * f4                                 # qi==0 K/V-build temps
    est = int(1.35 * (weights + small + io + k_bytes + v_bytes + max(step, build)))

    cap = None
    try:
        cap = pltpu.get_tpu_info().vmem_capacity_bytes
    except Exception:
        cap = None
    if cap is None:
        try:
            kind = jax.devices()[0].device_kind.lower()
            cap = 64 * 1024 * 1024 if "v7" in kind else 128 * 1024 * 1024
        except Exception:
            cap = 64 * 1024 * 1024
    hard_cap = min(int(cap * 0.82), 112 * 1024 * 1024)   # ~52 MiB on v7x, ~105 MiB on v5e/v6e
    return max(min(est, hard_cap), 16 * 1024 * 1024)


def make_attention_block_kernel(L_real, Lp, E, H, TL, Hc, FC):
    hd = E // H
    nh_chunks = H // Hc
    F = 4 * E
    nf_chunks = F // FC
    scale = 1.0 / math.sqrt(hd)
    eps = 1e-5
    bf16 = jnp.bfloat16

    def layer_norm(v, g, b):
        # statistics in f32
        m = jnp.mean(v, axis=-1, keepdims=True)
        var = jnp.mean((v - m) ** 2, axis=-1, keepdims=True)
        return (v - m) * jax.lax.rsqrt(var + eps) * g + b

    def kernel(x_full_ref, x_q_ref,
               ln1_g_ref, ln1_b_ref,
               wq_ref, bq_ref,
               wkv_ref, bkv_ref,
               wo_ref, bo_ref,
               ln2_g_ref, ln2_b_ref,
               w1_ref, fb1_ref,
               w2_ref, fb2_ref,
               o_ref,
               k_scr, v_scr):
        qi = pl.program_id(1)

        g1 = ln1_g_ref[...]          # (1, E) f32
        be1 = ln1_b_ref[...]         # (1, E) f32

        # ---- build head-major K^T / V cache for the whole (padded) sequence, once per batch ----
        # (k_scr / v_scr persist across the query-tile grid axis; that axis is "arbitrary")
        @pl.when(qi == 0)
        def _():
            x_full = x_full_ref[0]                                        # (Lp, E) f32
            xn_full = layer_norm(x_full, g1, be1).astype(bf16)
            kv = jnp.dot(xn_full, wkv_ref[...],
                         preferred_element_type=jnp.float32) + bkv_ref[...]
            kv = kv.astype(bf16)                                          # (Lp, 2E)
            # K stored transposed: one 2-D transpose at build time, natural (K, N) MXU RHS
            k_scr[...] = jnp.transpose(kv[:, :E], (1, 0)).reshape(H, hd, Lp)      # (H, hd, Lp)
            v_scr[...] = jnp.transpose(kv[:, E:].reshape(Lp, H, hd), (1, 0, 2))   # (H, Lp, hd)

        # ---- query tile ----
        x_q = x_q_ref[0]                                                  # (TL, E) f32
        xn_q = layer_norm(x_q, g1, be1)
        q = jnp.dot(xn_q.astype(bf16), wq_ref[...],
                    preferred_element_type=jnp.float32) + bq_ref[...]     # (TL, E) f32
        q = (q * scale).astype(bf16)                                      # scale folded into q

        # ---- attention: heads in chunks to bound the live (Hc, TL, Lp) score tensor ----
        acc = jnp.zeros((TL, E), jnp.float32)
        for ci in range(nh_chunks):
            h0 = ci * Hc
            q_c = jnp.transpose(q[:, h0 * hd:(h0 + Hc) * hd].reshape(TL, Hc, hd),
                                (1, 0, 2))                                # (Hc, TL, hd) bf16
            k_c = k_scr[pl.ds(h0, Hc), :, :]                              # (Hc, hd, Lp) bf16
            v_c = v_scr[pl.ds(h0, Hc), :, :]                              # (Hc, Lp, hd) bf16

            s = jnp.einsum('hqd,hdk->hqk', q_c, k_c,
                           preferred_element_type=jnp.float32)            # (Hc, TL, Lp) f32
            if Lp != L_real:                                              # mask padded key rows
                key_idx = jax.lax.broadcasted_iota(jnp.int32, (1, 1, Lp), 2)
                s = jnp.where(key_idx < L_real, s, -1e30)
            s_max = jnp.max(s, axis=-1, keepdims=True)
            p = jnp.exp(s - s_max)
            denom = jnp.sum(p, axis=-1, keepdims=True)
            o_h = jnp.einsum('hqk,hkd->hqd', p.astype(bf16), v_c,
                             preferred_element_type=jnp.float32)          # (Hc, TL, hd) f32
            # post-PV normalization (Hc*TL*hd multiplies, EUP reciprocal)
            o_h = o_h * pl.reciprocal(denom, approx=True)
            attn_c = jnp.transpose(o_h.astype(bf16), (1, 0, 2)).reshape(TL, Hc * hd)
            acc = acc + jnp.dot(attn_c, wo_ref[pl.ds(h0 * hd, Hc * hd), :],
                                preferred_element_type=jnp.float32)
        attn_out = acc + bo_ref[...]

        # residual 1 (dropout = identity at inference)
        x1 = x_q + attn_out

        # ---- LayerNorm 2 + feed-forward (hidden 4E processed in chunks) ----
        xn2 = layer_norm(x1, ln2_g_ref[...], ln2_b_ref[...]).astype(bf16)
        ff = jnp.zeros((TL, E), jnp.float32)
        for fi in range(nf_chunks):
            c0 = fi * FC
            h1 = jnp.dot(xn2, w1_ref[:, pl.ds(c0, FC)],
                         preferred_element_type=jnp.float32) + fb1_ref[:, pl.ds(c0, FC)]
            h1 = jnp.maximum(h1, 0.0)
            ff = ff + jnp.dot(h1.astype(bf16), w2_ref[pl.ds(c0, FC), :],
                              preferred_element_type=jnp.float32)
        ff = ff + fb2_ref[...]

        # residual 2
        o_ref[0] = (x1 + ff).astype(o_ref.dtype)

    return kernel


def attention_block(x, params, num_heads):
    """x: (B, L, E) float32.  params: f32 dict of weights (already transposed for x @ W)."""
    B, L, E = x.shape
    H = num_heads
    assert E % H == 0, "embedding_dim must be divisible by num_heads"
    hd = E // H
    bf16 = jnp.bfloat16

    prefer = _prefer_tile()
    # Pad L so a good query tile always exists (padded keys are masked inside the kernel).
    Lp = ((L + 127) // 128) * 128 if L > prefer else L
    TL = _choose_q_tile(Lp, prefer)
    nq = Lp // TL
    Hc = _choose_head_chunk(H, TL, Lp)
    FC = _choose_ffn_chunk(4 * E)

    xp = x if Lp == L else jnp.pad(x, ((0, 0), (0, Lp - L), (0, 0)))

    # Split the fused QKV projection so K/V can be cached across query tiles;
    # cast all matmul weights to bf16 (biases / LN params stay f32).
    wqkv = params["wqkv"]
    wq = wqkv[:, :E].astype(bf16)
    wkv = wqkv[:, E:].astype(bf16)
    bq = params["bqkv"][:, :E]
    bkv = params["bqkv"][:, E:]

    weights = [
        params["ln1_g"], params["ln1_b"],
        wq, bq, wkv, bkv,
        params["wo"].astype(bf16), params["bo"],
        params["ln2_g"], params["ln2_b"],
        params["w1"].astype(bf16), params["b1"],
        params["w2"].astype(bf16), params["b2"],
    ]

    kernel = make_attention_block_kernel(L, Lp, E, H, TL, Hc, FC)

    # Full-L x: only read at the K/V-build step -> single-buffered.
    x_full_spec = pl.BlockSpec((1, Lp, E), lambda b, q: (b, 0, 0),
                               pipeline_mode=pl.Buffered(1))
    # Per-tile x for the query / residual path (double-buffered).
    x_q_spec = pl.BlockSpec((1, TL, E), lambda b, q: (b, q, 0))
    out_spec = pl.BlockSpec((1, TL, E), lambda b, q: (b, q, 0))

    def w_spec(arr):
        n = arr.ndim
        # Weights are grid-invariant: single-buffer them to halve their VMEM footprint.
        return pl.BlockSpec(arr.shape, lambda b, q, _n=n: (0,) * _n,
                            pipeline_mode=pl.Buffered(1))

    fn = pl.pallas_call(
        kernel,
        out_shape=jax.ShapeDtypeStruct((B, Lp, E), x.dtype),
        grid_spec=pltpu.PrefetchScalarGridSpec(
            num_scalar_prefetch=0,
            grid=(B, nq),
            in_specs=[x_full_spec, x_q_spec] + [w_spec(w) for w in weights],
            out_specs=out_spec,
            scratch_shapes=[pltpu.VMEM((H, hd, Lp), bf16),   # K^T cache
                            pltpu.VMEM((H, Lp, hd), bf16)],  # V cache
        ),
        compiler_params=pltpu.CompilerParams(
            dimension_semantics=("parallel", "arbitrary"),
            vmem_limit_bytes=_vmem_limit_bytes(Lp, TL, E, H, Hc, FC),
        ),
    )
    out = fn(xp, xp, *weights)
    if Lp != L:
        out = out[:, :L, :]
    return out


def init_params(key, E, H):
    """Deterministic synthetic parameters matching nn.MultiheadAttention + FFN + 2x LayerNorm.

    PyTorch stores Linear weights as (out, in); we pre-transpose to (in, out) so the
    kernel computes x @ W.  Biases are stored as (1, out) for TPU-friendly 2D layout.
    """
    keys = jax.random.split(key, 6)
    s = 0.02
    params = {
        "ln1_g": jnp.ones((1, E), jnp.float32),
        "ln1_b": jnp.zeros((1, E), jnp.float32),
        "wqkv": s * jax.random.normal(keys[0], (E, 3 * E), jnp.float32),
        "bqkv": s * jax.random.normal(keys[1], (1, 3 * E), jnp.float32),
        "wo": s * jax.random.normal(keys[2], (E, E), jnp.float32),
        "bo": jnp.zeros((1, E), jnp.float32),
        "ln2_g": jnp.ones((1, E), jnp.float32),
        "ln2_b": jnp.zeros((1, E), jnp.float32),
        "w1": s * jax.random.normal(keys[3], (E, 4 * E), jnp.float32),
        "b1": s * jax.random.normal(keys[4], (1, 4 * E), jnp.float32),
        "w2": s * jax.random.normal(keys[5], (4 * E, E), jnp.float32),
        "b2": jnp.zeros((1, E), jnp.float32),
    }
    return params


def reference_jax(x, p, H):
    """Pure-JAX f32 reference of the same forward pass (for a sanity check)."""
    B, L, E = x.shape
    hd = E // H
    eps = 1e-5

    def ln(v, g, b):
        m = jnp.mean(v, axis=-1, keepdims=True)
        var = jnp.mean((v - m) ** 2, axis=-1, keepdims=True)
        return (v - m) * jax.lax.rsqrt(var + eps) * g + b

    xn = ln(x, p["ln1_g"][0], p["ln1_b"][0])
    qkv = xn @ p["wqkv"] + p["bqkv"][0]
    q, k, v = qkv[..., :E], qkv[..., E:2 * E], qkv[..., 2 * E:]
    q = q.reshape(B, L, H, hd).transpose(0, 2, 1, 3)
    k = k.reshape(B, L, H, hd).transpose(0, 2, 1, 3)
    v = v.reshape(B, L, H, hd).transpose(0, 2, 1, 3)
    s = jnp.einsum("bhld,bhmd->bhlm", q, k) / math.sqrt(hd)
    a = jax.nn.softmax(s, axis=-1)
    o = jnp.einsum("bhlm,bhmd->bhld", a, v).transpose(0, 2, 1, 3).reshape(B, L, E)
    attn_out = o @ p["wo"] + p["bo"][0]
    x1 = x + attn_out
    xn2 = ln(x1, p["ln2_g"][0], p["ln2_b"][0])
    ff = jnp.maximum(xn2 @ p["w1"] + p["b1"][0], 0.0) @ p["w2"] + p["b2"][0]
    return x1 + ff


if __name__ == "__main__":
    B, L, E, H = 2, 8, 32, 4
    key = jax.random.PRNGKey(0)
    kx, kp = jax.random.split(key)
    x = jax.random.normal(kx, (B, L, E), jnp.float32)
    params = init_params(kp, E, H)

    out = attention_block(x, params, H)
    out = jax.block_until_ready(out)

    ref = reference_jax(x, params, H)
    assert out.shape == (B, L, E)
    max_err = float(jnp.max(jnp.abs(out - ref)))
    # bf16 matmul path + approx reciprocal -> loosened tolerance vs the f32 reference
    assert jnp.allclose(out, ref, atol=2e-2, rtol=2e-2), f"mismatch vs JAX reference (max err {max_err})"
    print("KERNEL_OK")
</pallas_src>

<mosaic_0001>
module attributes {stable_mosaic.version = 11 : i64} {
  func.func @kernel(%arg0: i32, %arg1: i32, %arg2: memref<1x8x32xf32, #tpu.memory_space<vmem>>, %arg3: memref<1x8x32xf32, #tpu.memory_space<vmem>>, %arg4: memref<1x32xf32, #tpu.memory_space<vmem>>, %arg5: memref<1x32xf32, #tpu.memory_space<vmem>>, %arg6: memref<32x32xbf16, #tpu.memory_space<vmem>>, %arg7: memref<1x32xf32, #tpu.memory_space<vmem>>, %arg8: memref<32x64xbf16, #tpu.memory_space<vmem>>, %arg9: memref<1x64xf32, #tpu.memory_space<vmem>>, %arg10: memref<32x32xbf16, #tpu.memory_space<vmem>>, %arg11: memref<1x32xf32, #tpu.memory_space<vmem>>, %arg12: memref<1x32xf32, #tpu.memory_space<vmem>>, %arg13: memref<1x32xf32, #tpu.memory_space<vmem>>, %arg14: memref<32x128xbf16, #tpu.memory_space<vmem>>, %arg15: memref<1x128xf32, #tpu.memory_space<vmem>>, %arg16: memref<128x32xbf16, #tpu.memory_space<vmem>>, %arg17: memref<1x32xf32, #tpu.memory_space<vmem>>, %arg18: memref<1x8x32xf32, #tpu.memory_space<vmem>>, %arg19: memref<4x8x8xbf16, #tpu.memory_space<vmem>>, %arg20: memref<4x8x8xbf16, #tpu.memory_space<vmem>>) attributes {dimension_semantics = [#tpu.dimension_semantics<parallel>, #tpu.dimension_semantics<arbitrary>], iteration_bounds = array<i64: 2, 1>, scalar_prefetch = 0 : i64, scratch_operands = 2 : i64, tpu.core_type = #tpu.core_type<tc>, window_params = [{pipeline_mode = #tpu.pipeline_mode<synchronous>, transform_indices = @transform_0, window_bounds = array<i64: 1, 8, 32>}, {transform_indices = @transform_1, window_bounds = array<i64: 1, 8, 32>}, {pipeline_mode = #tpu.pipeline_mode<synchronous>, transform_indices = @transform_2, window_bounds = array<i64: 1, 32>}, {pipeline_mode = #tpu.pipeline_mode<synchronous>, transform_indices = @transform_3, window_bounds = array<i64: 1, 32>}, {pipeline_mode = #tpu.pipeline_mode<synchronous>, transform_indices = @transform_4, window_bounds = array<i64: 32, 32>}, {pipeline_mode = #tpu.pipeline_mode<synchronous>, transform_indices = @transform_5, window_bounds = array<i64: 1, 32>}, {pipeline_mode = #tpu.pipeline_mode<synchronous>, transform_indices = @transform_6, window_bounds = array<i64: 32, 64>}, {pipeline_mode = #tpu.pipeline_mode<synchronous>, transform_indices = @transform_7, window_bounds = array<i64: 1, 64>}, {pipeline_mode = #tpu.pipeline_mode<synchronous>, transform_indices = @transform_8, window_bounds = array<i64: 32, 32>}, {pipeline_mode = #tpu.pipeline_mode<synchronous>, transform_indices = @transform_9, window_bounds = array<i64: 1, 32>}, {pipeline_mode = #tpu.pipeline_mode<synchronous>, transform_indices = @transform_10, window_bounds = array<i64: 1, 32>}, {pipeline_mode = #tpu.pipeline_mode<synchronous>, transform_indices = @transform_11, window_bounds = array<i64: 1, 32>}, {pipeline_mode = #tpu.pipeline_mode<synchronous>, transform_indices = @transform_12, window_bounds = array<i64: 32, 128>}, {pipeline_mode = #tpu.pipeline_mode<synchronous>, transform_indices = @transform_13, window_bounds = array<i64: 1, 128>}, {pipeline_mode = #tpu.pipeline_mode<synchronous>, transform_indices = @transform_14, window_bounds = array<i64: 128, 32>}, {pipeline_mode = #tpu.pipeline_mode<synchronous>, transform_indices = @transform_15, window_bounds = array<i64: 1, 32>}, {transform_indices = @transform_16, window_bounds = array<i64: 1, 8, 32>}]} {
    %c0 = arith.constant 0 : index
    %c0_0 = arith.constant 0 : index
    %0 = vector.load %arg4[%c0, %c0_0] : memref<1x32xf32, #tpu.memory_space<vmem>>, vector<1x32xf32>
    %c0_1 = arith.constant 0 : index
    %c0_2 = arith.constant 0 : index
    %1 = vector.load %arg5[%c0_1, %c0_2] : memref<1x32xf32, #tpu.memory_space<vmem>>, vector<1x32xf32>
    %c0_i32 = arith.constant 0 : i32
    %2 = arith.cmpi eq, %arg1, %c0_i32 : i32
    %3 = arith.extui %2 : i1 to i32
    %c0_i32_3 = arith.constant 0 : i32
    %4 = arith.cmpi ne, %3, %c0_i32_3 : i32
    scf.if %4 {
      %c0_57 = arith.constant 0 : index
      %c0_58 = arith.constant 0 : index
      %c0_59 = arith.constant 0 : index
      %110 = vector.load %arg2[%c0_57, %c0_58, %c0_59] : memref<1x8x32xf32, #tpu.memory_space<vmem>>, vector<1x8x32xf32>
      %111 = vector.shape_cast %110 : vector<1x8x32xf32> to vector<8x32xf32>
      %cst_60 = arith.constant dense<0.000000e+00> : vector<8xf32>
      %112 = vector.multi_reduction <add>, %111, %cst_60 [1] : vector<8x32xf32> to vector<8xf32>
      %113 = vector.shape_cast %112 : vector<8xf32> to vector<8x1xf32>
      %cst_61 = arith.constant 3.200000e+01 : f32
      %114 = vector.broadcast %cst_61 : f32 to vector<8x1xf32>
      %115 = arith.divf %113, %114 : vector<8x1xf32>
      %116 = vector.broadcast %115 : vector<8x1xf32> to vector<8x32xf32>
      %117 = arith.subf %111, %116 : vector<8x32xf32>
      %118 = arith.mulf %117, %117 : vector<8x32xf32>
      %cst_62 = arith.constant dense<0.000000e+00> : vector<8xf32>
      %119 = vector.multi_reduction <add>, %118, %cst_62 [1] : vector<8x32xf32> to vector<8xf32>
      %120 = vector.shape_cast %119 : vector<8xf32> to vector<8x1xf32>
      %cst_63 = arith.constant 3.200000e+01 : f32
      %121 = vector.broadcast %cst_63 : f32 to vector<8x1xf32>
      %122 = arith.divf %120, %121 : vector<8x1xf32>
      %123 = vector.broadcast %115 : vector<8x1xf32> to vector<8x32xf32>
      %124 = arith.subf %111, %123 : vector<8x32xf32>
      %cst_64 = arith.constant 9.99999974E-6 : f32
      %125 = vector.broadcast %cst_64 : f32 to vector<8x1xf32>
      %126 = arith.addf %122, %125 : vector<8x1xf32>
      %127 = math.rsqrt %126 : vector<8x1xf32>
      %128 = vector.broadcast %127 : vector<8x1xf32> to vector<8x32xf32>
      %129 = arith.mulf %124, %128 : vector<8x32xf32>
      %130 = vector.broadcast %0 : vector<1x32xf32> to vector<8x32xf32>
      %131 = arith.mulf %129, %130 : vector<8x32xf32>
      %132 = vector.broadcast %1 : vector<1x32xf32> to vector<8x32xf32>
      %133 = arith.addf %131, %132 : vector<8x32xf32>
      %134 = arith.truncf %133 : vector<8x32xf32> to vector<8x32xbf16>
      %c0_65 = arith.constant 0 : index
      %c0_66 = arith.constant 0 : index
      %135 = vector.load %arg8[%c0_65, %c0_66] : memref<32x64xbf16, #tpu.memory_space<vmem>>, vector<32x64xbf16>
      %cst_67 = arith.constant dense<0.000000e+00> : vector<8x64xf32>
      %136 = tpu.matmul %134, %135, %cst_67 {dimension_numbers = #tpu.dot_dimension_numbers<[1], [0], [0], [1], [0, 0, 1, 1], [], []>} : vector<8x32xbf16>, vector<32x64xbf16>, vector<8x64xf32> -> vector<8x64xf32>
      %c0_68 = arith.constant 0 : index
      %c0_69 = arith.constant 0 : index
      %137 = vector.load %arg9[%c0_68, %c0_69] : memref<1x64xf32, #tpu.memory_space<vmem>>, vector<1x64xf32>
      %138 = vector.broadcast %137 : vector<1x64xf32> to vector<8x64xf32>
      %139 = arith.addf %136, %138 : vector<8x64xf32>
      %140 = arith.truncf %139 : vector<8x64xf32> to vector<8x64xbf16>
      %141 = vector.extract_strided_slice %140 {offsets = [0, 0], sizes = [8, 32], strides = [1, 1]} : vector<8x64xbf16> to vector<8x32xbf16>
      %142 = tpu.transpose %141, [1, 0] : vector<8x32xbf16> -> vector<32x8xbf16>
      %143 = vector.shape_cast %142 : vector<32x8xbf16> to vector<4x8x8xbf16>
      %c0_70 = arith.constant 0 : index
      %c0_71 = arith.constant 0 : index
      %c0_72 = arith.constant 0 : index
      %144 = vector.load %arg19[%c0_70, %c0_71, %c0_72] : memref<4x8x8xbf16, #tpu.memory_space<vmem>>, vector<4x8x8xbf16>
      tpu.vector_store %arg19[%c0_70, %c0_71, %c0_72], %143 {strides = array<i32>} : memref<4x8x8xbf16, #tpu.memory_space<vmem>>, vector<4x8x8xbf16>,
      %145 = vector.extract_strided_slice %140 {offsets = [0, 32], sizes = [8, 32], strides = [1, 1]} : vector<8x64xbf16> to vector<8x32xbf16>
      %146 = vector.shape_cast %145 : vector<8x32xbf16> to vector<8x4x8xbf16>
      %147 = tpu.transpose %146, [1, 0, 2] : vector<8x4x8xbf16> -> vector<4x8x8xbf16>
      %c0_73 = arith.constant 0 : index
      %c0_74 = arith.constant 0 : index
      %c0_75 = arith.constant 0 : index
      %148 = vector.load %arg20[%c0_73, %c0_74, %c0_75] : memref<4x8x8xbf16, #tpu.memory_space<vmem>>, vector<4x8x8xbf16>
      tpu.vector_store %arg20[%c0_73, %c0_74, %c0_75], %147 {strides = array<i32>} : memref<4x8x8xbf16, #tpu.memory_space<vmem>>, vector<4x8x8xbf16>,
    } else {
    }
    %c0_4 = arith.constant 0 : index
    %c0_5 = arith.constant 0 : index
    %c0_6 = arith.constant 0 : index
    %5 = vector.load %arg3[%c0_4, %c0_5, %c0_6] : memref<1x8x32xf32, #tpu.memory_space<vmem>>, vector<1x8x32xf32>
    %6 = vector.shape_cast %5 : vector<1x8x32xf32> to vector<8x32xf32>
    %cst = arith.constant dense<0.000000e+00> : vector<8xf32>
    %7 = vector.multi_reduction <add>, %6, %cst [1] : vector<8x32xf32> to vector<8xf32>
    %8 = vector.shape_cast %7 : vector<8xf32> to vector<8x1xf32>
    %cst_7 = arith.constant 3.200000e+01 : f32
    %9 = vector.broadcast %cst_7 : f32 to vector<8x1xf32>
    %10 = arith.divf %8, %9 : vector<8x1xf32>
    %11 = vector.broadcast %10 : vector<8x1xf32> to vector<8x32xf32>
    %12 = arith.subf %6, %11 : vector<8x32xf32>
    %13 = arith.mulf %12, %12 : vector<8x32xf32>
    %cst_8 = arith.constant dense<0.000000e+00> : vector<8xf32>
    %14 = vector.multi_reduction <add>, %13, %cst_8 [1] : vector<8x32xf32> to vector<8xf32>
    %15 = vector.shape_cast %14 : vector<8xf32> to vector<8x1xf32>
    %cst_9 = arith.constant 3.200000e+01 : f32
    %16 = vector.broadcast %cst_9 : f32 to vector<8x1xf32>
    %17 = arith.divf %15, %16 : vector<8x1xf32>
    %18 = vector.broadcast %10 : vector<8x1xf32> to vector<8x32xf32>
    %19 = arith.subf %6, %18 : vector<8x32xf32>
    %cst_10 = arith.constant 9.99999974E-6 : f32
    %20 = vector.broadcast %cst_10 : f32 to vector<8x1xf32>
    %21 = arith.addf %17, %20 : vector<8x1xf32>
    %22 = math.rsqrt %21 : vector<8x1xf32>
    %23 = vector.broadcast %22 : vector<8x1xf32> to vector<8x32xf32>
    %24 = arith.mulf %19, %23 : vector<8x32xf32>
    %25 = vector.broadcast %0 : vector<1x32xf32> to vector<8x32xf32>
    %26 = arith.mulf %24, %25 : vector<8x32xf32>
    %27 = vector.broadcast %1 : vector<1x32xf32> to vector<8x32xf32>
    %28 = arith.addf %26, %27 : vector<8x32xf32>
    %29 = arith.truncf %28 : vector<8x32xf32> to vector<8x32xbf16>
    %c0_11 = arith.constant 0 : index
    %c0_12 = arith.constant 0 : index
    %30 = vector.load %arg6[%c0_11, %c0_12] : memref<32x32xbf16, #tpu.memory_space<vmem>>, vector<32x32xbf16>
    %cst_13 = arith.constant dense<0.000000e+00> : vector<8x32xf32>
    %31 = tpu.matmul %29, %30, %cst_13 {dimension_numbers = #tpu.dot_dimension_numbers<[1], [0], [0], [1], [0, 0, 1, 1], [], []>} : vector<8x32xbf16>, vector<32x32xbf16>, vector<8x32xf32> -> vector<8x32xf32>
    %c0_14 = arith.constant 0 : index
    %c0_15 = arith.constant 0 : index
    %32 = vector.load %arg7[%c0_14, %c0_15] : memref<1x32xf32, #tpu.memory_space<vmem>>, vector<1x32xf32>
    %33 = vector.broadcast %32 : vector<1x32xf32> to vector<8x32xf32>
    %34 = arith.addf %31, %33 : vector<8x32xf32>
    %cst_16 = arith.constant 0.353553385 : f32
    %35 = vector.broadcast %cst_16 : f32 to vector<8x32xf32>
    %36 = arith.mulf %34, %35 : vector<8x32xf32>
    %37 = arith.truncf %36 : vector<8x32xf32> to vector<8x32xbf16>
    %cst_17 = arith.constant 0.000000e+00 : f32
    %38 = vector.broadcast %cst_17 : f32 to vector<8x32xf32>
    %39 = vector.shape_cast %37 : vector<8x32xbf16> to vector<8x4x8xbf16>
    %40 = tpu.transpose %39, [1, 0, 2] : vector<8x4x8xbf16> -> vector<4x8x8xbf16>
    %c0_18 = arith.constant 0 : index
    %c0_19 = arith.constant 0 : index
    %c0_20 = arith.constant 0 : index
    %41 = vector.load %arg19[%c0_18, %c0_19, %c0_20] : memref<4x8x8xbf16, #tpu.memory_space<vmem>>, vector<4x8x8xbf16>
    %c0_21 = arith.constant 0 : index
    %c0_22 = arith.constant 0 : index
    %c0_23 = arith.constant 0 : index
    %42 = vector.load %arg20[%c0_21, %c0_22, %c0_23] : memref<4x8x8xbf16, #tpu.memory_space<vmem>>, vector<4x8x8xbf16>
    "tpu.trace_start"() <{level = 10 : i32, message = "hqd,hdk->hqk"}> : () -> ()
    %cst_24 = arith.constant dense<0.000000e+00> : vector<4x8x8xf32>
    %43 = tpu.matmul %40, %41, %cst_24 {dimension_numbers = #tpu.dot_dimension_numbers<[2], [1], [1], [2], [0, 0, 0, 1, 1, 2], [0], [0]>} : vector<4x8x8xbf16>, vector<4x8x8xbf16>, vector<4x8x8xf32> -> vector<4x8x8xf32>
    "tpu.trace_stop"() : () -> ()
    %cst_25 = arith.constant dense<0xFF800000> : vector<4x8xf32>
    %44 = vector.multi_reduction <maximumf>, %43, %cst_25 [2] : vector<4x8x8xf32> to vector<4x8xf32>
    %45 = vector.shape_cast %44 : vector<4x8xf32> to vector<4x8x1xf32>
    %46 = vector.broadcast %45 : vector<4x8x1xf32> to vector<4x8x8xf32>
    %47 = arith.subf %43, %46 : vector<4x8x8xf32>
    %48 = math.exp %47 : vector<4x8x8xf32>
    %cst_26 = arith.constant dense<0.000000e+00> : vector<4x8xf32>
    %49 = vector.multi_reduction <add>, %48, %cst_26 [2] : vector<4x8x8xf32> to vector<4x8xf32>
    %50 = vector.shape_cast %49 : vector<4x8xf32> to vector<4x8x1xf32>
    %51 = arith.truncf %48 : vector<4x8x8xf32> to vector<4x8x8xbf16>
    "tpu.trace_start"() <{level = 10 : i32, message = "hqk,hkd->hqd"}> : () -> ()
    %cst_27 = arith.constant dense<0.000000e+00> : vector<4x8x8xf32>
    %52 = tpu.matmul %51, %42, %cst_27 {dimension_numbers = #tpu.dot_dimension_numbers<[2], [1], [1], [2], [0, 0, 0, 1, 1, 2], [0], [0]>} : vector<4x8x8xbf16>, vector<4x8x8xbf16>, vector<4x8x8xf32> -> vector<4x8x8xf32>
    "tpu.trace_stop"() : () -> ()
    %53 = tpu.reciprocal %50 {approx = true} : vector<4x8x1xf32> -> vector<4x8x1xf32>
    %54 = vector.broadcast %53 : vector<4x8x1xf32> to vector<4x8x8xf32>
    %55 = arith.mulf %52, %54 : vector<4x8x8xf32>
    %56 = arith.truncf %55 : vector<4x8x8xf32> to vector<4x8x8xbf16>
    %57 = tpu.transpose %56, [1, 0, 2] : vector<4x8x8xbf16> -> vector<8x4x8xbf16>
    %58 = vector.shape_cast %57 : vector<8x4x8xbf16> to vector<8x32xbf16>
    %c0_28 = arith.constant 0 : index
    %c0_29 = arith.constant 0 : index
    %59 = vector.load %arg10[%c0_28, %c0_29] : memref<32x32xbf16, #tpu.memory_space<vmem>>, vector<32x32xbf16>
    %cst_30 = arith.constant dense<0.000000e+00> : vector<8x32xf32>
    %60 = tpu.matmul %58, %59, %cst_30 {dimension_numbers = #tpu.dot_dimension_numbers<[1], [0], [0], [1], [0, 0, 1, 1], [], []>} : vector<8x32xbf16>, vector<32x32xbf16>, vector<8x32xf32> -> vector<8x32xf32>
    %61 = arith.addf %38, %60 : vector<8x32xf32>
    %c0_31 = arith.constant 0 : index
    %c0_32 = arith.constant 0 : index
    %62 = vector.load %arg11[%c0_31, %c0_32] : memref<1x32xf32, #tpu.memory_space<vmem>>, vector<1x32xf32>
    %63 = vector.broadcast %62 : vector<1x32xf32> to vector<8x32xf32>
    %64 = arith.addf %61, %63 : vector<8x32xf32>
    %65 = arith.addf %6, %64 : vector<8x32xf32>
    %c0_33 = arith.constant 0 : index
    %c0_34 = arith.constant 0 : index
    %66 = vector.load %arg12[%c0_33, %c0_34] : memref<1x32xf32, #tpu.memory_space<vmem>>, vector<1x32xf32>
    %c0_35 = arith.constant 0 : index
    %c0_36 = arith.constant 0 : index
    %67 = vector.load %arg13[%c0_35, %c0_36] : memref<1x32xf32, #tpu.memory_space<vmem>>, vector<1x32xf32>
    %cst_37 = arith.constant dense<0.000000e+00> : vector<8xf32>
    %68 = vector.multi_reduction <add>, %65, %cst_37 [1] : vector<8x32xf32> to vector<8xf32>
    %69 = vector.shape_cast %68 : vector<8xf32> to vector<8x1xf32>
    %cst_38 = arith.constant 3.200000e+01 : f32
    %70 = vector.broadcast %cst_38 : f32 to vector<8x1xf32>
    %71 = arith.divf %69, %70 : vector<8x1xf32>
    %72 = vector.broadcast %71 : vector<8x1xf32> to vector<8x32xf32>
    %73 = arith.subf %65, %72 : vector<8x32xf32>
    %74 = arith.mulf %73, %73 : vector<8x32xf32>
    %cst_39 = arith.constant dense<0.000000e+00> : vector<8xf32>
    %75 = vector.multi_reduction <add>, %74, %cst_39 [1] : vector<8x32xf32> to vector<8xf32>
    %76 = vector.shape_cast %75 : vector<8xf32> to vector<8x1xf32>
    %cst_40 = arith.constant 3.200000e+01 : f32
    %77 = vector.broadcast %cst_40 : f32 to vector<8x1xf32>
    %78 = arith.divf %76, %77 : vector<8x1xf32>
    %79 = vector.broadcast %71 : vector<8x1xf32> to vector<8x32xf32>
    %80 = arith.subf %65, %79 : vector<8x32xf32>
    %cst_41 = arith.constant 9.99999974E-6 : f32
    %81 = vector.broadcast %cst_41 : f32 to vector<8x1xf32>
    %82 = arith.addf %78, %81 : vector<8x1xf32>
    %83 = math.rsqrt %82 : vector<8x1xf32>
    %84 = vector.broadcast %83 : vector<8x1xf32> to vector<8x32xf32>
    %85 = arith.mulf %80, %84 : vector<8x32xf32>
    %86 = vector.broadcast %66 : vector<1x32xf32> to vector<8x32xf32>
    %87 = arith.mulf %85, %86 : vector<8x32xf32>
    %88 = vector.broadcast %67 : vector<1x32xf32> to vector<8x32xf32>
    %89 = arith.addf %87, %88 : vector<8x32xf32>
    %90 = arith.truncf %89 : vector<8x32xf32> to vector<8x32xbf16>
    %cst_42 = arith.constant 0.000000e+00 : f32
    %91 = vector.broadcast %cst_42 : f32 to vector<8x32xf32>
    %c0_43 = arith.constant 0 : index
    %c0_44 = arith.constant 0 : index
    %92 = vector.load %arg14[%c0_43, %c0_44] : memref<32x128xbf16, #tpu.memory_space<vmem>>, vector<32x128xbf16>
    %cst_45 = arith.constant dense<0.000000e+00> : vector<8x128xf32>
    %93 = tpu.matmul %90, %92, %cst_45 {dimension_numbers = #tpu.dot_dimension_numbers<[1], [0], [0], [1], [0, 0, 1, 1], [], []>} : vector<8x32xbf16>, vector<32x128xbf16>, vector<8x128xf32> -> vector<8x128xf32>
    %c0_46 = arith.constant 0 : index
    %c0_47 = arith.constant 0 : index
    %94 = vector.load %arg15[%c0_46, %c0_47] : memref<1x128xf32, #tpu.memory_space<vmem>>, vector<1x128xf32>
    %95 = vector.broadcast %94 : vector<1x128xf32> to vector<8x128xf32>
    %96 = arith.addf %93, %95 : vector<8x128xf32>
    %cst_48 = arith.constant 0.000000e+00 : f32
    %97 = vector.broadcast %cst_48 : f32 to vector<8x128xf32>
    %98 = arith.maximumf %96, %97 : vector<8x128xf32>
    %99 = arith.truncf %98 : vector<8x128xf32> to vector<8x128xbf16>
    %c0_49 = arith.constant 0 : index
    %c0_50 = arith.constant 0 : index
    %100 = vector.load %arg16[%c0_49, %c0_50] : memref<128x32xbf16, #tpu.memory_space<vmem>>, vector<128x32xbf16>
    %cst_51 = arith.constant dense<0.000000e+00> : vector<8x32xf32>
    %101 = tpu.matmul %99, %100, %cst_51 {dimension_numbers = #tpu.dot_dimension_numbers<[1], [0], [0], [1], [0, 0, 1, 1], [], []>} : vector<8x128xbf16>, vector<128x32xbf16>, vector<8x32xf32> -> vector<8x32xf32>
    %102 = arith.addf %91, %101 : vector<8x32xf32>
    %c0_52 = arith.constant 0 : index
    %c0_53 = arith.constant 0 : index
    %103 = vector.load %arg17[%c0_52, %c0_53] : memref<1x32xf32, #tpu.memory_space<vmem>>, vector<1x32xf32>
    %104 = vector.broadcast %103 : vector<1x32xf32> to vector<8x32xf32>
    %105 = arith.addf %102, %104 : vector<8x32xf32>
    %106 = arith.addf %65, %105 : vector<8x32xf32>
    %c0_54 = arith.constant 0 : index
    %c0_55 = arith.constant 0 : index
    %c0_56 = arith.constant 0 : index
    %107 = vector.load %arg18[%c0_54, %c0_55, %c0_56] : memref<1x8x32xf32, #tpu.memory_space<vmem>>, vector<1x8x32xf32>
    %108 = vector.shape_cast %107 : vector<1x8x32xf32> to vector<8x32xf32>
    %109 = vector.shape_cast %106 : vector<8x32xf32> to vector<1x8x32xf32>
    tpu.vector_store %arg18[%c0_54, %c0_55, %c0_56], %109 {strides = array<i32>} : memref<1x8x32xf32, #tpu.memory_space<vmem>>, vector<1x8x32xf32>,
    return
  }
  func.func @transform_0(%arg0: i32, %arg1: i32) -> (i32, i32, i32) {
    %c0_i32 = arith.constant 0 : i32
    %c0_i32_0 = arith.constant 0 : i32
    %c0_i32_1 = arith.constant 0 : i32
    return %arg0, %c0_i32, %c0_i32_0 : i32, i32, i32
  }
  func.func @transform_1(%arg0: i32, %arg1: i32) -> (i32, i32, i32) {
    %c0_i32 = arith.constant 0 : i32
    %c0_i32_0 = arith.constant 0 : i32
    return %arg0, %arg1, %c0_i32 : i32, i32, i32
  }
  func.func @transform_2(%arg0: i32, %arg1: i32) -> (i32, i32) {
    %c0_i32 = arith.constant 0 : i32
    %c0_i32_0 = arith.constant 0 : i32
    %c0_i32_1 = arith.constant 0 : i32
    return %c0_i32, %c0_i32_0 : i32, i32
  }
  func.func @transform_3(%arg0: i32, %arg1: i32) -> (i32, i32) {
    %c0_i32 = arith.constant 0 : i32
    %c0_i32_0 = arith.constant 0 : i32
    %c0_i32_1 = arith.constant 0 : i32
    return %c0_i32, %c0_i32_0 : i32, i32
  }
  func.func @transform_4(%arg0: i32, %arg1: i32) -> (i32, i32) {
    %c0_i32 = arith.constant 0 : i32
    %c0_i32_0 = arith.constant 0 : i32
    %c0_i32_1 = arith.constant 0 : i32
    return %c0_i32, %c0_i32_0 : i32, i32
  }
  func.func @transform_5(%arg0: i32, %arg1: i32) -> (i32, i32) {
    %c0_i32 = arith.constant 0 : i32
    %c0_i32_0 = arith.constant 0 : i32
    %c0_i32_1 = arith.constant 0 : i32
    return %c0_i32, %c0_i32_0 : i32, i32
  }
  func.func @transform_6(%arg0: i32, %arg1: i32) -> (i32, i32) {
    %c0_i32 = arith.constant 0 : i32
    %c0_i32_0 = arith.constant 0 : i32
    %c0_i32_1 = arith.constant 0 : i32
    return %c0_i32, %c0_i32_0 : i32, i32
  }
  func.func @transform_7(%arg0: i32, %arg1: i32) -> (i32, i32) {
    %c0_i32 = arith.constant 0 : i32
    %c0_i32_0 = arith.constant 0 : i32
    %c0_i32_1 = arith.constant 0 : i32
    return %c0_i32, %c0_i32_0 : i32, i32
  }
  func.func @transform_8(%arg0: i32, %arg1: i32) -> (i32, i32) {
    %c0_i32 = arith.constant 0 : i32
    %c0_i32_0 = arith.constant 0 : i32
    %c0_i32_1 = arith.constant 0 : i32
    return %c0_i32, %c0_i32_0 : i32, i32
  }
  func.func @transform_9(%arg0: i32, %arg1: i32) -> (i32, i32) {
    %c0_i32 = arith.constant 0 : i32
    %c0_i32_0 = arith.constant 0 : i32
    %c0_i32_1 = arith.constant 0 : i32
    return %c0_i32, %c0_i32_0 : i32, i32
  }
  func.func @transform_10(%arg0: i32, %arg1: i32) -> (i32, i32) {
    %c0_i32 = arith.constant 0 : i32
    %c0_i32_0 = arith.constant 0 : i32
    %c0_i32_1 = arith.constant 0 : i32
    return %c0_i32, %c0_i32_0 : i32, i32
  }
  func.func @transform_11(%arg0: i32, %arg1: i32) -> (i32, i32) {
    %c0_i32 = arith.constant 0 : i32
    %c0_i32_0 = arith.constant 0 : i32
    %c0_i32_1 = arith.constant 0 : i32
    return %c0_i32, %c0_i32_0 : i32, i32
  }
  func.func @transform_12(%arg0: i32, %arg1: i32) -> (i32, i32) {
    %c0_i32 = arith.constant 0 : i32
    %c0_i32_0 = arith.constant 0 : i32
    %c0_i32_1 = arith.constant 0 : i32
    return %c0_i32, %c0_i32_0 : i32, i32
  }
  func.func @transform_13(%arg0: i32, %arg1: i32) -> (i32, i32) {
    %c0_i32 = arith.constant 0 : i32
    %c0_i32_0 = arith.constant 0 : i32
    %c0_i32_1 = arith.constant 0 : i32
    return %c0_i32, %c0_i32_0 : i32, i32
  }
  func.func @transform_14(%arg0: i32, %arg1: i32) -> (i32, i32) {
    %c0_i32 = arith.constant 0 : i32
    %c0_i32_0 = arith.constant 0 : i32
    %c0_i32_1 = arith.constant 0 : i32
    return %c0_i32, %c0_i32_0 : i32, i32
  }
  func.func @transform_15(%arg0: i32, %arg1: i32) -> (i32, i32) {
    %c0_i32 = arith.constant 0 : i32
    %c0_i32_0 = arith.constant 0 : i32
    %c0_i32_1 = arith.constant 0 : i32
    return %c0_i32, %c0_i32_0 : i32, i32
  }
  func.func @transform_16(%arg0: i32, %arg1: i32) -> (i32, i32, i32) {
    %c0_i32 = arith.constant 0 : i32
    %c0_i32_0 = arith.constant 0 : i32
    return %arg0, %arg1, %c0_i32 : i32, i32, i32
  }
}

</mosaic_0001>

<bundles_post_ra>
// kernel: tpu_custom_call.1
= control target key start
LH: loop header
LB: loop body
LE: loop exit
PB: predicated region body
PF: predicated region fallthrough
CT: control target
= control target key end

     0   :  { %s3253_s0 = inlined_call_operand.vmem [shape: f32[2,8,32], index: 0, kind: input, shape index: {}]   ;;  %s3254_s1 = inlined_call_operand.vmem [shape: f32[2,8,32], index: 1, kind: input, shape index: {}]   ;;  %s3255_s2 = inlined_call_operand.vmem [shape: f32[1,32], index: 2, kind: input, shape index: {}]   ;;  %s3256_s3 = inlined_call_operand.vmem [shape: f32[1,32], index: 3, kind: input, shape index: {}]   ;;  %s3257_s4 = inlined_call_operand.vmem [shape: bf16[32,32], index: 4, kind: input, shape index: {}]   ;;  %s3258_s5 = inlined_call_operand.hbm [shape: f32[1,32], index: 5, kind: input, shape index: {}]   ;;  %s3259_s6 = inlined_call_operand.vmem [shape: bf16[32,64], index: 6, kind: input, shape index: {}]   ;;  %s3260_s7 = inlined_call_operand.hbm [shape: f32[1,64], index: 7, kind: input, shape index: {}]   ;;  %s3261_s8 = inlined_call_operand.vmem [shape: bf16[32,32], index: 8, kind: input, shape index: {}]   ;;  %s3262_s9 = inlined_call_operand.hbm [shape: f32[1,32], index: 9, kind: input, shape index: {}]   ;;  %s3263_s10 = inlined_call_operand.vmem [shape: f32[1,32], index: 10, kind: input, shape index: {}]   ;;  %s3264_s11 = inlined_call_operand.vmem [shape: f32[1,32], index: 11, kind: input, shape index: {}]   ;;  %s3265_s12 = inlined_call_operand.vmem [shape: bf16[32,128], index: 12, kind: input, shape index: {}]   ;;  %s3266_s13 = inlined_call_operand.vmem [shape: f32[1,128], index: 13, kind: input, shape index: {}]   ;;  %s3267_s14 = inlined_call_operand.vmem [shape: bf16[128,32], index: 14, kind: input, shape index: {}]   ;;  %s3268_s15 = inlined_call_operand.vmem [shape: f32[1,32], index: 15, kind: input, shape index: {}]   ;;  %s3269_s16 = inlined_call_operand.hbm [shape: f32[2,8,32], index: 16, kind: output, shape index: {}]  }
   0x1   :  { %3284 = sst [smem:[#allocation22_spill]] %s3253_s0 }
   0x2   :  { %3285 = sst [smem:[#allocation23_spill]] %s3260_s7 }
   0x3   :  { %3286 = sst [smem:[#allocation24_spill]] %s3268_s15 }
   0x4   :  { %3287 = sst [smem:[#allocation25_spill]] %s3269_s16 }
   0x5   :  { %21 = vsyncpa [#allocation5], 0 }
   0x6   :  { %22 = vsyncpa [#allocation8], 0 }
   0x7   :  { %23 = vsyncpa [#allocation6], 0 }
   0x8   :  { %25 = vsyncpa [#allocation6 + $0x1], 0  ;;  %s2806_s21 = smov 0   ;;  %s2808_s22 = smov 0  }
   0x9   :  { %s2810_s23 = smov 0   ;;  %s2812_s24 = smov 0  }
   0xa   :  { %s2814_s25 = smov 0   ;;  %s2816_s26 = smov 0  }
   0xb LB: > { %3288 = sst [smem:[#allocation14_spill]] %s2683_s21  ;;  %s2201_s27 = sadd.s32 4294967295, %s2703_s26   ;;  %s2703_s26 = sphi %s2816_s26, %s31_s26   ;;  %s2699_s25 = sphi %s2814_s25, %s3321_s25   ;;  %s2695_s24 = sphi %s2812_s24, %s3317_s24   ;;  %s2691_s23 = sphi %s2810_s23, %s3316_s23   ;;  %s2687_s22 = sphi %s2808_s22, %s3320_s22   ;;  %s2683_s21 = sphi %s2806_s21, %s3319_s21  }
   0xc   : > { %3289 = sst [smem:[#allocation15_spill]] %s2691_s23  ;;  %s2202_s28 = sadd.s32 4294967294, %s2703_s26  }
   0xd   : > { %3290 = sst [smem:[#allocation16_spill]] %s2699_s25  ;;  %s43_s29 = sadd.s32 1, %s2699_s25 }
   0xe   : > { %3291 = sst [smem:[#allocation17_spill]] %s2703_s26  ;;  %s400_s30 = sadd.s32 1, %s2691_s23 }
   0xf   : > { %p45_p0 = scmp.ge.s32.totalorder %s43_s29, 2  ;;  %p410_p1 = scmp.ne.s32.totalorder %s2691_s23, %s2687_s22 }
  0x10   : > { %p411_p2 = scmp.eq.s32.totalorder %s2201_s27, 1  ;;  %p416_p3 = scmp.ne.s32.totalorder %s2687_s22, %s2683_s21 }
  0x11   : > { %s3323_s29 = smov (%p45_p0, %s43_s29), 0  ;;  %p417_p5 = scmp.eq.s32.totalorder %s2202_s28, 1 }
  0x12   : > { %3292 = sst [smem:[#allocation18_spill]] %s3323_s29  ;;  %p2846_p4 = por %p411_p2, %p410_p1 }
  0x13   : > { %s395_s17 = ssub.s32 %s2699_s25, %s3323_s29  ;;  %p2203_p6 = scmp.ge.s32.totalorder %s2703_s26, 1 }
  0x14   : > { %s3293_s0 = scalar_select %p2846_p4, 1, 0 }
  0x15   : > { %p398_p7 = scmp.eq.s32.totalorder %s395_s17, 0  ;;  %p2853_p8 = por %p417_p5, %p416_p3 }
  0x16   : > { %3294 = sst [smem:[#allocation19_spill]] %s3293_s0  ;;  %p424_p9 = scmp.lt.s32.totalorder %s2703_s26, 3 }
  0x17   : > { %s3295_s18 = scalar_select %p2853_p8, 1, 0 }
  0x18   : > { %s2859_s19 = scalar_select %p398_p7, %s2691_s23, %s400_s30  }
  0x19   : > { %3296 = sst [smem:[#allocation20_spill]] %s3295_s18  ;;  %p2861_p10 = pnand %p2203_p6, %p424_p9 }
  0x1a   : > { %3297 = sst [smem:[#allocation21_spill]] %s2859_s19  ;;  %p2865_p11 = scmp.eq.s32.totalorder %s2201_s27, 0 }
  0x1b   : > { %s3298_s20 = scalar_select %p2861_p10, 1, 0 }
  0x1c   : > { %s3299_s21 = scalar_select %p2865_p11, 1, 0 }
  0x1d   : > { %p2411_p12 = pneg %p2861_p10  ;;  %s2705_s28 = smov [#allocation7]  }
  0x1e   : > { %s467_s17 = sshll.u32 %s2705_s28, 4  ;;  %s2706_s30 = smov [#allocation4]   ;;  %s468_s17 = int_to_ptr.vmem [resolvable:$true] %s467_s17 }
  0x1f   : > { %p2873_p13 = pnand %p2865_p11, %p2411_p12  ;;  %s453_s25 = sshll.u32 %s2706_s30, 4  ;;  %s2877_s25 = int_to_ptr.vmem [resolvable:$true] %s453_s25 }
  0x20   : > { %s3301_s7 = sld [smem:[#allocation23_spill]] }
  0x21   : > { %p2887_p1 = pneg %p2873_p13 }
  0x26   : > { %s2533_s23 = scalar_lea.hbm %s3301_s7, 16 }
  0x27   : > { %p2534_p0 = scmp.ne.s32.totalorder %s3301_s7, %s2533_s23  ;;  %p2540_p5 = scmp.lt.u32.totalorder %s2533_s23, %s3301_s7 }
  0x29   : > { %p2536_p2 = pnand %p2887_p1, %p2534_p0 }
  0x2b   : > { %p2537_p3 = pneg %p2536_p2 }
  0x2d   : > { %p2542_p6 = pnand %p2540_p5, %p2537_p3 }
  0x2f   : > { %2545 = shalt.err (!%p2542_p6)
}
  0x30   : > { %s2546_s19 = scalar_lea.vmem %s468_s17, 16  ;;  %s2553_s26 = scalar_lea.vmem %s468_s17, 32 }
  0x31   : > { %p2547_p7 = scmp.ne.s32.totalorder %s468_s17, %s2546_s19  ;;  %p2554_p8 = scmp.lt.s32.totalorder %s468_s17, %s468_s17 }
  0x32   : > { %p2555_p4 = scmp.lt.s32.totalorder %s2553_s26, %s2546_s19 }
  0x33   : > { %p2549_p9 = pnand %p2547_p7, %p2887_p1 }
  0x34   : > { %p2556_p11 = por %p2555_p4, %p2554_p8 }
  0x35   : > { %p2550_p12 = pneg %p2549_p9 }
  0x37   : > { %p2557_p10 = pnand %p2556_p11, %p2550_p12 }
  0x39   : > { %2560 = shalt.err (!%p2557_p10)
}
  0x3a   : > { %2417 = dma.hbm_to_vmem [thread:$0]  (!%p2873_p13), %s3301_s7, 16, %s468_s17, [#allocation8]  }
  0x3b   : > { %s2561_s30 = scalar_lea.hbm %s3258_s5, 16 }
  0x3c   : > { %p2562_p0 = scmp.ne.s32.totalorder %s3258_s5, %s2561_s30  ;;  %p2568_p8 = scmp.lt.u32.totalorder %s2561_s30, %s3258_s5 }
  0x3e   : > { %p2564_p2 = pnand %p2562_p0, %p2887_p1 }
  0x40   : > { %p2565_p4 = pneg %p2564_p2 }
  0x42   : > { %p2570_p10 = pnand %p2568_p8, %p2565_p4 }
  0x44   : > { %2573 = shalt.err (!%p2570_p10)
}
  0x45   : > { %s2574_s17 = scalar_lea.vmem %s2877_s25, 16  ;;  %s2581_s15 = scalar_lea.vmem %s2877_s25, 32 }
  0x46   : > { %p2575_p11 = scmp.ne.s32.totalorder %s2877_s25, %s2574_s17  ;;  %p2582_p6 = scmp.lt.s32.totalorder %s2877_s25, %s2877_s25 }
  0x47   : > { %p2583_p7 = scmp.lt.s32.totalorder %s2581_s15, %s2574_s17 }
  0x48   : > { %p2577_p3 = pnand %p2575_p11, %p2887_p1 }
  0x49   : > { %p2584_p9 = por %p2583_p7, %p2582_p6 }
  0x4a   : > { %p2578_p5 = pneg %p2577_p3 }
  0x4c   : > { %p2585_p12 = pnand %p2584_p9, %p2578_p5 }
  0x4e   : > { %2588 = shalt.err (!%p2585_p12)
}
  0x4f   : > { %2414 = dma.hbm_to_vmem [thread:$0]  (!%p2873_p13), %s3258_s5, 16, %s2877_s25, [#allocation5]  }
  0x50   : > { %s2707_s27 = smov [#allocation9]   ;;  %s2589_s19 = scalar_lea.hbm %s3262_s9, 16 }
  0x51   : > { %s481_s16 = sshll.u32 %s2707_s27, 4  ;;  %p2590_p0 = scmp.ne.s32.totalorder %s3262_s9, %s2589_s19  ;;  %s482_s16 = int_to_ptr.vmem [resolvable:$true] %s481_s16 }
  0x52   : > { %p2596_p8 = scmp.lt.u32.totalorder %s2589_s19, %s3262_s9 }
  0x53   : > { %p2592_p2 = pnand %p2590_p0, %p2887_p1 }
  0x55   : > { %p2593_p4 = pneg %p2592_p2 }
  0x57   : > { %p2598_p10 = pnand %p2596_p8, %p2593_p4 }
  0x59   : > { %2601 = shalt.err (!%p2598_p10)
}
  0x5a   : > { %s2602_s25 = scalar_lea.vmem %s482_s16, 16  ;;  %s2609_s0 = scalar_lea.vmem %s482_s16, 32 }
  0x5b   : > { %p2603_p11 = scmp.ne.s32.totalorder %s482_s16, %s2602_s25  ;;  %p2610_p6 = scmp.lt.s32.totalorder %s482_s16, %s482_s16 }
  0x5c   : > { %p2611_p7 = scmp.lt.s32.totalorder %s2609_s0, %s2602_s25 }
  0x5d   : > { %p2605_p3 = pnand %p2603_p11, %p2887_p1 }
  0x5e   : > { %p2612_p9 = por %p2611_p7, %p2610_p6 }
  0x5f   : > { %p2606_p5 = pneg %p2605_p3 }
  0x61   : > { %p2613_p12 = pnand %p2612_p9, %p2606_p5 }
  0x63   : > { %2616 = shalt.err (!%p2613_p12)
}
  0x64   : > { %2420 = dma.hbm_to_vmem [thread:$0]  (!%p2873_p13), %s3262_s9, 16, %s482_s16, [#allocation8]  }
  0x65   : > { %p3303_p0 = scmp.ne.s32.totalorder %s3298_s20, 0 }
  0x66   : > { %p3304_p2 = scmp.ne.s32.totalorder (!%p3303_p0), %s3299_s21, 0 }
  0x67   : > { %522 = sbr.rel (%p3303_p0) target bundleno = 2546 (0x9f2), region = 84 }
  0x6e   : > { %2670 = dma.done.wait (%p3304_p2), [#allocation5], 16  }
  0x6f   : > { %2672 = vsyncadd (%p3304_p2), [#allocation5], 4294967280 }
  0x70   : > { %2674 = dma.done.wait (%p3304_p2), [#allocation8], 32  }
  0x71   : > { %2676 = vsyncadd (%p3304_p2), [#allocation8], 4294967264  ;;  %p586_p1 = scmp.lt.s32.totalorder %s2695_s24, 1  ;;  %s3305_s16 = sld [smem:[#allocation22_spill]]  ;;  %vm605_vm0 = vcmask 261120   ;;  %v2495_v14 = vld [vmem:[%s3259_s6] sm:$0xff]   ;;  %v621_v52 = vlaneseq }
  0x72   : > { %v2708_v15 = vmov 0.0   ;;  %v2496_v16 = vld [vmem:[%s3259_s6 + $0x8] sm:$0xff]   ;;  %vm2709_vm1 = vmmov 0   ;;  %v2258_v24 = vld [vmem:[%s3255_s2] ss:$0 sm:$0xff]  ;;  %s2711_s30 = smov 120  }
  0x73   : > { %s587_s7 = scalar_select %p586_p1, %s2695_s24, 1  ;;  %2297 = vmatprep.subr.bf16.mxu1 %v2708_v15  ;;  %2325 = vmatprep.subr.bf16.mxu0 %v2708_v15  ;;  %v2259_v26 = vld [vmem:[%s3256_s3] ss:$0 sm:$0xff]  ;;  %v2498_v34 = vld [vmem:[%s3257_s4 + $0x8] sm:$0xff]   ;;  %v2215_v45 = vld [vmem:[#allocation7] ss:$0 sm:$0xff] }
  0x74   : > { %2298 = vmatpush3.bf16.msra.mxu1 %v2495_v14  ;;  %2301 = vmatprep.mubr.msk.bf16.mxu1 %vm2709_vm1, %v2708_v15  ;;  %v2497_v31 = vld [vmem:[%s3257_s4] sm:$0xff]   ;;  %s2712_s19 = smov 104   ;;  %v2714_v53 = vmov 1983009808   ;;  %v622_v55 = vshrl.u32 %v621_v52, 7  ;;  %vm732_vm2 = vcmask 60416  }
  0x75   : > { %s2213_s29 = sshll.u32 %s587_s7, 3  ;;  %2299 = vmatprep.subr.bf16.mxu1 %v2708_v15  ;;  %2327 = vmatprep.mubr.msk.bf16.mxu0 %vm2709_vm1, %v2708_v15  ;;  %v2223_v41 = vld [vmem:[#allocation4] ss:$0 sm:$0xff]  ;;  %v754_v54 = vunpack.c.l.s4 %v2714_v53  ;;  %v2715_v57 = vmov 1934713408   ;;  %vm1201_vm3 = vcmask 1043456  }
  0x76   : > { %s596_s26 = scalar_lea.vmem %s3254_s1, %s2213_s29  ;;  %v771_v58 = vunpack.c.l.s4 %v2715_v57  ;;  %vm1197_vm4 = vcmask 64512   ;;  %s2717_s0 = smov 8   ;;  %vm1786_vm5 = vcmask 130048   ;;  %vm1789_vm6 = vcmask 195584  }
  0x77   : > { %s589_s23 = scalar_lea.vmem %s3305_s16, %s2213_s29  ;;  %v2963_v1 = vld [vmem:[%s596_s26] sm:$0xff]  ;;  %s2713_s26 = smov 96   ;;  %v755_v56 = vunpack.c.0.s8 %v754_v54 }
  0x78   : > { %v604_v0 = vld [vmem:[%s589_s23] sm:$0xff]  ;;  %v924_v3 = vsel %vm605_vm0, %v2963_v1, 0.0  ;;  %2300 = vmatpush3.bf16.msra.mxu1 %v2496_v16  ;;  %s2710_s23 = smov 112   ;;  %v772_v62 = vunpack.c.0.s8 %v771_v58  ;;  %s2718_s18 = smov 16  }
  0x79   : > { %v606_v2 = vsel %vm605_vm0, %v604_v0, 0.0  ;;  %2305 = vmatprep.subr.bf16.mxu1 %v2708_v15  ;;  %v3006_v59 = vsub.s32 %v755_v56, %v622_v55  ;;  %s2719_s27 = smov 24   ;;  %s583_s17 = sand.u32 1, %s2687_s22  }
  0x7a   : > { %607 = vadd.xlane.f32.xlu0 %v606_v2  ;;  %s2212_s15 = sshll.u32 %s583_s17, 3  ;;  %s2255_s7 = sshll.u32 %s2695_s24, 7 }
  0x7b   : > { %s585_s29 = scalar_lea.vmem [#allocation10], %s2212_s15  ;;  %s2070_s24 = scalar_lea.sflag [#allocation6], %s583_s17 }
  0x7c   : > { %s2084_s28 = sshll.u32 %s585_s29, 4  ;;  %s2720_s21 = smov [#allocation10]   ;;  %s3207_s28 = int_to_ptr.vmem [resolvable:$true] %s2084_s28 }
  0x7d   : > { %s2621_s15 = sshll.u32 %s2720_s21, 4  ;;  %s2622_s15 = int_to_ptr.vmem [resolvable:$false] %s2621_s15 }
  0x7e   : > { %925 = vadd.xlane.f32.xlu0 %v924_v3  ;;  %s2623_s25 = scalar_lea.vmem %s2622_s15, 256  ;;  %p2624_p11 = scmp.lt.s32.totalorder %s3207_s28, %s2622_s15 }
 0x107   : > { %v608_v4 = vpop.xlane.xlu0 %607 }
 0x108   : > { %v610_v5 = vmul.f32 0.03125, %v608_v4 }
 0x10a   : > { %v611_v6 = vsub.f32 %v604_v0, %v610_v5  ;;  %v3012_v5 = vsub.s32 %v772_v62, %v622_v55 }
 0x10b   : > { %v926_v7 = vpop.xlane.xlu0 %925 }
 0x10c   : > { %v928_v8 = vmul.f32 0.03125, %v926_v7  ;;  %v612_v9 = vmul.f32 %v611_v6, %v611_v6 }
 0x10e   : > { %v929_v10 = vsub.f32 %v2963_v1, %v928_v8  ;;  %v613_v11 = vsel %vm605_vm0, %v612_v9, 0.0 }
 0x10f   : > { %614 = vadd.xlane.f32.xlu1 %v613_v11 }
 0x110   : > { %v930_v12 = vmul.f32 %v929_v10, %v929_v10 }
 0x112   : > { %v931_v13 = vsel %vm605_vm0, %v930_v12, 0.0 }
 0x113   : > { %932 = vadd.xlane.f32.xlu1 %v931_v13 }
 0x19c   : > { %v615_v17 = vpop.xlane.xlu1 %614 }
 0x19d   : > { %v616_v18 = vmul.f32 0.03125, %v615_v17  ;;  %v2716_v17 = vmov 0  }
 0x19f   : > { %v617_v19 = vadd.f32 1e-05, %v616_v18 }
 0x1a0   : > { %v933_v20 = vpop.xlane.xlu1 %932 }
 0x1a1   : > { %2511 = vrsqrt.f32 %v617_v19  ;;  %v934_v21 = vmul.f32 0.03125, %v933_v20 }
 0x1a3   : > { %v935_v22 = vadd.f32 1e-05, %v934_v21 }
 0x1a5   : > { %2513 = vrsqrt.f32 %v935_v22 }
 0x1ab   : > { %v2512_v23 = vpop.eup %2511 }
 0x1ac   : > { %v619_v25 = vmul.f32 %v2512_v23, %v611_v6 }
 0x1ae   : > { %v626_v27 = vmul.f32 %v2258_v24, %v619_v25 }
 0x1af   : > { %v2514_v28 = vpop.eup %2513 }
 0x1b0   : > { %v937_v29 = vmul.f32 %v2514_v28, %v929_v10  ;;  %v633_v30 = vadd.f32 %v2259_v26, %v626_v27 }
 0x1b2   : > { %v634_v32 = vpack.c.bf16 %v633_v30, %v633_v30  ;;  %v944_v33 = vmul.f32 %v2258_v24, %v937_v29 }
 0x1b4   : > { %2302 = vmatmul.mubr.msk.bf16.vlgmr.msra.gmra.mrb[0].mxu1 %vm605_vm0, %v634_v32  ;;  %v951_v35 = vadd.f32 %v2259_v26, %v944_v33 }
 0x1b5   : > { %2306 = vmatpush3.bf16.msra.mxu1 %v2497_v31  ;;  %2309 = vmatprep.mubr.msk.bf16.mxu1 %vm2709_vm1, %v2708_v15 }
 0x1b6   : > { %2307 = vmatprep.subr.bf16.mxu1 %v2708_v15  ;;  %v952_v36 = vpack.c.bf16 %v951_v35, %v951_v35 }
 0x1b9   : > { %2308 = vmatpush3.bf16.msra.mxu1 %v2498_v34 }
 0x1ba   : > { %2313 = vmatprep.subr.bf16.mxu1 %v2708_v15 }
 0x1bc   : > { %2310 = vmatmul.mubr.msk.bf16.vlgmr.msra.gmra.mrb[4].mxu1 %vm605_vm0, %v952_v36 }
 0x1bd   : > { %2315 = vmatprep.mubr.msk.bf16.mxu1 %vm2709_vm1, %v2708_v15 }
 0x287   : > { %v695_v37 = vpop.f32.mrb[0].mxu1 }
 0x288   : > { %v2303_v38 = vpop.f32.mrb[1].mxu1  ;;  %v696_v49 = vadd.f32 %v2215_v45, %v695_v37 }
 0x289   : > { %v698_v39 = vpop.f32.mrb[2].mxu1 }
 0x28a   : > { %v2304_v40 = vpop.f32.mrb[3].mxu1  ;;  %v701_v51 = vpack.c.bf16 %v696_v49, %v696_v49 }
 0x28f   : > { %v1013_v42 = vpop.f32.mrb[4].mxu1 }
 0x290   : > { %v1014_v43 = vadd.f32 %v2223_v41, %v1013_v42  ;;  %v2311_v44 = vpop.f32.mrb[5].mxu1 }
 0x291   : > { %v1016_v46 = vpop.f32.mrb[6].mxu1 }
 0x292   : > { %v1019_v47 = vmul.f32 0.35355338, %v1014_v43  ;;  %v2312_v48 = vpop.f32.mrb[7].mxu1 }
 0x294   : > { %v1020_v50 = vpack.c.bf16 %v1019_v47, %v1019_v47 }
 0x296   : > { %1024 = vrot.lane.b32.xlu1 %v1020_v50, %s2710_s23  ;;  %1022 = vrot.lane.b32.xlu0 %v1020_v50, %s2711_s30  ;;  %v1034_v0 = vrot.slane %v1020_v50, %v3006_v59 }
 0x29a   : > { %1026 = vrot.lane.b32.xlu1 %v1020_v50, %s2712_s19  ;;  %738 = vrot.lane.b32.xlu0 %v701_v51, %s2711_s30 }
 0x29e   : > { %740 = vrot.lane.b32.xlu0 %v701_v51, %s2710_s23  ;;  %s3308_s23 = sld [smem:[#allocation25_spill]] }
 0x2a2   : > { %742 = vrot.lane.b32.xlu0 %v701_v51, %s2712_s19 }
 0x2a4   : > { %s3309_s30 = smov %s3308_s23  ;;  %s3205_s19 = scalar_lea.hbm %s3308_s23, %s2255_s7 }
 0x2a6   : > { %744 = vrot.lane.b32.xlu0 %v701_v51, %s2713_s26 }
 0x2bd   : > { %702 = vxpose.xlu1.c.b16.start.end [1/1] (short) (narrow) %v701_v51, 32 }
 0x308   : > { %v1025_v60 = vpop.permute.xlu1 %1024  ;;  %v1023_v61 = vpop.permute.xlu0 %1022 }
 0x309   : > { %v1042_v63 = vrot.slane %v1025_v60, %v3006_v59  ;;  %v1068_v8 = vrot.slane %v1023_v61, %v3006_v59 }
 0x30b   : > { %v1043_v6 = vcombine.low %v1034_v0, %v1042_v63  ;;  %v1044_v7 = vcombine.high %v1034_v0, %v1042_v63 }
 0x30c   : > { %v1027_v2 = vpop.permute.xlu1 %1026  ;;  %v739_v3 = vpop.permute.xlu0 %738 }
 0x30d   : > { %v1076_v4 = vrot.slane %v1027_v2, %v3006_v59  ;;  %746 = vrot.lane.b32.xlu0 %v739_v3, %s2713_s26  ;;  %v1051_v12 = vrot.slane %v1043_v6, %v3012_v5  ;;  %v1058_v13 = vrot.slane %v1044_v7, %v3012_v5 }
 0x30f   : > { %v1077_v9 = vcombine.low %v1068_v8, %v1076_v4  ;;  %v1078_v10 = vcombine.high %v1068_v8, %v1076_v4  ;;  %v1059_v21 = vcombine.high %v1051_v12, %v2716_v17  ;;  %v1060_v22 = vcombine.high %v1058_v13, %v2716_v17 }
 0x310   : > { %v741_v11 = vpop.permute.xlu0 %740  ;;  %v1099_v29 = vshrl.u32 %v1051_v12, 16  ;;  %v1115_v30 = vshrl.u32 %v1058_v13, 16 }
 0x311   : > { %748 = vrot.lane.b32.xlu0 %v741_v11, %s2713_s26  ;;  %v1085_v14 = vrot.slane %v1077_v9, %v3012_v5  ;;  %v1092_v16 = vrot.slane %v1078_v10, %v3012_v5  ;;  %v1107_v25 = vshrl.u32 %v1059_v21, 16  ;;  %v1123_v26 = vshrl.u32 %v1060_v22, 16 }
 0x313   : > { %v1093_v18 = vcombine.high %v1085_v14, %v2716_v17  ;;  %v1094_v19 = vcombine.high %v1092_v16, %v2716_v17  ;;  %v1100_v27 = vshrl.u32 %v1085_v14, 16  ;;  %v1116_v28 = vshrl.u32 %v1092_v16, 16 }
 0x314   : > { %v743_v20 = vpop.permute.xlu0 %742  ;;  %v1097_v37 = vpack.i.b16 %v1085_v14, %v1051_v12  ;;  %v1113_v38 = vpack.i.b16 %v1092_v16, %v1058_v13 }
 0x315   : > { %750 = vrot.lane.b32.xlu0 %v743_v20, %s2713_s26  ;;  %v1108_v23 = vshrl.u32 %v1093_v18, 16  ;;  %v1124_v24 = vshrl.u32 %v1094_v19, 16  ;;  %v1101_v33 = vpack.i.b16 %v1100_v27, %v1099_v29  ;;  %v1105_v34 = vpack.i.b16 %v1093_v18, %v1059_v21  ;;  %s2617_s26 = scalar_lea.vmem %s3207_s28, 128 }
 0x316   : > { %v1117_v35 = vpack.i.b16 %v1116_v28, %v1115_v30  ;;  %v1121_v36 = vpack.i.b16 %v1094_v19, %v1060_v22  ;;  %v1127_v43 = vcombine.low %v1097_v37, %v1113_v38  ;;  %p2618_p13 = scmp.ne.s32.totalorder %s3207_s28, %s2617_s26  ;;  %p2625_p3 = scmp.lt.s32.totalorder %s2623_s25, %s2617_s26 }
 0x317   : > { %v1109_v31 = vpack.i.b16 %v1108_v23, %v1107_v25  ;;  %v1125_v32 = vpack.i.b16 %v1124_v24, %v1123_v26 }
 0x318   : > { %v1135_v40 = vcombine.low %v1105_v34, %v1121_v36  ;;  %v1152_v41 = vcombine.low %v1101_v33, %v1117_v35  ;;  %v1134_v50 = vrot.slane %v1127_v43, %v3006_v59  ;;  %v745_v14 = vpop.permute.xlu0 %744  ;;  %p2626_p5 = por %p2625_p3, %p2624_p11 }
 0x319   : > { %v1160_v39 = vcombine.low %v1109_v31, %v1125_v32  ;;  %v759_v19 = vrot.slane %v745_v14, %v3006_v59 }
 0x31a   : > { %v1142_v47 = vrot.slane %v1135_v40, %v3006_v59  ;;  %v1159_v48 = vrot.slane %v1152_v41, %v3006_v59 }
 0x31b   : > { %v1167_v44 = vrot.slane %v1160_v39, %v3006_v59 }
 0x31c   : > { %v1143_v54 = vcombine.low %v1134_v50, %v1142_v47 }
 0x31d   : > { %v1168_v51 = vcombine.low %v1159_v48, %v1167_v44 }
 0x31e   : > { %v1150_v58 = vrot.slane %v1143_v54, %v3012_v5 }
 0x31f   : > { %v1175_v55 = vrot.slane %v1168_v51, %v3012_v5 }
 0x320   : > { %v1151_v3 = vcombine.high %v1150_v58, %v2716_v17  ;;  %v1180_v8 = vshrl.u32 %v1150_v58, 16 }
 0x321   : > { %v1179_v61 = vpack.i.b16 %v1175_v55, %v1150_v58  ;;  %v1176_v62 = vcombine.high %v1175_v55, %v2716_v17  ;;  %v1181_v6 = vshrl.u32 %v1175_v55, 16 }
 0x322   : > { %v1186_v12 = vshrl.u32 %v1151_v3, 16 }
 0x323   : > { %v710_v42 = vpop.trf.xlu1  ;;  %v1185_v4 = vpack.i.b16 %v1176_v62, %v1151_v3  ;;  %v1182_v9 = vpack.i.b16 %v1181_v6, %v1180_v8  ;;  %v1187_v11 = vshrl.u32 %v1176_v62, 16 }
 0x324   : > { %v2219_v45 = vcombine.low %v710_v42, %v710_v42  ;;  %v2220_v46 = vcombine.high %v710_v42, %v710_v42 }
 0x325   : > { %v1188_v13 = vpack.i.b16 %v1187_v11, %v1186_v12 }
 0x326   : > { %733 = vst.msk [vmem:[#allocation2] sm:$0xf] %vm732_vm2, %v2219_v45  ;;  %734 = vst.msk [vmem:[#allocation2 + $0x4] sm:$0xf] %vm732_vm2, %v2220_v46 }
 0x327   : > { %v711_v49 = vpop.trf.xlu1 }
 0x328   : > { %v2221_v52 = vcombine.low %v711_v49, %v711_v49  ;;  %v2222_v53 = vcombine.high %v711_v49, %v711_v49 }
 0x32a   : > { %735 = vst.msk [vmem:[#allocation2 + $0x8] sm:$0xf] %vm732_vm2, %v2221_v52  ;;  %736 = vst.msk [vmem:[#allocation2 + $0xc] sm:$0xf] %vm732_vm2, %v2222_v53 }
 0x32d   : > { %v1189_v56 = vld [vmem:[#allocation2] sm:$0xf]  ;;  %v1190_v60 = vld [vmem:[#allocation2 + $0x4] sm:$0xf] }
 0x32e   : > { %v1203_v57 = vsel %vm1201_vm3, %v1189_v56, 0  ;;  %v1249_v0 = vsel %vm1201_vm3, %v1190_v60, 0 }
 0x32f   : > { %2314 = vmatpush3.bf16.msra.mxu1 %v1203_v57 }
 0x330   : > { %2319 = vmatprep.subr.bf16.mxu1 %v2708_v15 }
 0x331   : > { %v1191_v63 = vld [vmem:[#allocation2 + $0x8] sm:$0xf]  ;;  %v1192_v7 = vld [vmem:[#allocation2 + $0xc] sm:$0xf] }
 0x332   : > { %2316 = vmatmul.mubr.msk.bf16.vlgmr.msra.gmra.mrb[8].mxu1 %vm1197_vm4, %v1179_v61  ;;  %v1295_v2 = vsel %vm1201_vm3, %v1191_v63, 0  ;;  %v1341_v10 = vsel %vm1201_vm3, %v1192_v7, 0 }
 0x333   : > { %2320 = vmatpush3.bf16.msra.mxu1 %v1249_v0  ;;  %2326 = vmatpush3.bf16.msra.mxu0 %v1295_v2 }
 0x334   : > { %2321 = vmatprep.mubr.msk.bf16.mxu1 %vm2709_vm1, %v2708_v15  ;;  %2331 = vmatprep.subr.bf16.mxu1 %v2708_v15 }
 0x335   : > { %2337 = vmatprep.subr.bf16.mxu0 %v2708_v15 }
 0x336   : > { %2328 = vmatmul.mubr.msk.bf16.vlgmr.msra.gmra.mrb[0].mxu0 %vm1197_vm4, %v1185_v4 }
 0x337   : > { %2339 = vmatprep.mubr.msk.bf16.mxu0 %vm2709_vm1, %v2708_v15 }
 0x33a   : > { %2322 = vmatmul.mubr.msk.bf16.vlgmr.msra.gmra.mrb[12].mxu1 %vm1197_vm4, %v1182_v9 }
 0x33b   : > { %2332 = vmatpush3.bf16.msra.mxu1 %v1341_v10  ;;  %2333 = vmatprep.mubr.msk.bf16.mxu1 %vm2709_vm1, %v2708_v15 }
 0x33c   : > { %2343 = vmatprep.subr.bf16.mxu1 %v2708_v15 }
 0x342   : > { %2334 = vmatmul.mubr.msk.bf16.vlgmr.msra.gmra.mrb[16].mxu1 %vm1197_vm4, %v1188_v13 }
 0x343   : > { %2345 = vmatprep.mubr.msk.bf16.mxu1 %vm2709_vm1, %v2708_v15 }
 0x37f   : > { %v747_v16 = vpop.permute.xlu0 %746 }
 0x380   : > { %v793_v26 = vrot.slane %v747_v16, %v3006_v59 }
 0x383   : > { %v749_v18 = vpop.permute.xlu0 %748 }
 0x384   : > { %v767_v20 = vrot.slane %v749_v18, %v3006_v59 }
 0x386   : > { %v768_v21 = vcombine.low %v759_v19, %v767_v20  ;;  %v769_v22 = vcombine.high %v759_v19, %v767_v20 }
 0x387   : > { %v751_v23 = vpop.permute.xlu0 %750 }
 0x388   : > { %v776_v24 = vrot.slane %v768_v21, %v3012_v5  ;;  %v801_v25 = vrot.slane %v751_v23, %v3006_v59  ;;  %v783_v27 = vrot.slane %v769_v22, %v3012_v5 }
 0x38a   : > { %v802_v28 = vcombine.low %v793_v26, %v801_v25  ;;  %v803_v29 = vcombine.high %v793_v26, %v801_v25  ;;  %v784_v30 = vcombine.high %v776_v24, %v2716_v17  ;;  %v785_v33 = vcombine.high %v783_v27, %v2716_v17 }
 0x38b   : > { %v824_v34 = vshrl.u32 %v776_v24, 16  ;;  %v840_v40 = vshrl.u32 %v783_v27, 16 }
 0x38c   : > { %v810_v31 = vrot.slane %v802_v28, %v3012_v5  ;;  %v817_v32 = vrot.slane %v803_v29, %v3012_v5  ;;  %v832_v39 = vshrl.u32 %v784_v30, 16  ;;  %v848_v47 = vshrl.u32 %v785_v33, 16 }
 0x38e   : > { %v818_v35 = vcombine.high %v810_v31, %v2716_v17  ;;  %v819_v36 = vcombine.high %v817_v32, %v2716_v17  ;;  %v822_v37 = vpack.i.b16 %v810_v31, %v776_v24  ;;  %v825_v38 = vshrl.u32 %v810_v31, 16 }
 0x38f   : > { %v838_v41 = vpack.i.b16 %v817_v32, %v783_v27  ;;  %v841_v42 = vshrl.u32 %v817_v32, 16 }
 0x390   : > { %v826_v43 = vpack.i.b16 %v825_v38, %v824_v34  ;;  %v830_v44 = vpack.i.b16 %v818_v35, %v784_v30  ;;  %v833_v45 = vshrl.u32 %v818_v35, 16  ;;  %v846_v46 = vpack.i.b16 %v819_v36, %v785_v33 }
 0x391   : > { %v842_v48 = vpack.i.b16 %v841_v42, %v840_v40  ;;  %v849_v49 = vshrl.u32 %v819_v36, 16  ;;  %v852_v50 = vcombine.low %v822_v37, %v838_v41 }
 0x392   : > { %v834_v51 = vpack.i.b16 %v833_v45, %v832_v39  ;;  %v860_v52 = vcombine.low %v830_v44, %v846_v46 }
 0x393   : > { %v850_v53 = vpack.i.b16 %v849_v49, %v848_v47  ;;  %v877_v54 = vcombine.low %v826_v43, %v842_v48  ;;  %v859_v55 = vrot.slane %v852_v50, %v3006_v59 }
 0x394   : > { %v867_v56 = vrot.slane %v860_v52, %v3006_v59 }
 0x395   : > { %v885_v57 = vcombine.low %v834_v51, %v850_v53  ;;  %v884_v60 = vrot.slane %v877_v54, %v3006_v59 }
 0x396   : > { %v868_v58 = vcombine.low %v859_v55, %v867_v56 }
 0x397   : > { %v892_v61 = vrot.slane %v885_v57, %v3006_v59 }
 0x398   : > { %v875_v62 = vrot.slane %v868_v58, %v3012_v5 }
 0x399   : > { %v893_v63 = vcombine.low %v884_v60, %v892_v61 }
 0x39a   : > { %v876_v0 = vcombine.high %v875_v62, %v2716_v17  ;;  %v906_v6 = vshrl.u32 %v875_v62, 16 }
 0x39b   : > { %v900_v2 = vrot.slane %v893_v63, %v3012_v5 }
 0x39c   : > { %v914_v10 = vshrl.u32 %v876_v0, 16 }
 0x39d   : > { %v901_v3 = vcombine.high %v900_v2, %v2716_v17  ;;  %v904_v4 = vpack.i.b16 %v900_v2, %v875_v62  ;;  %v907_v7 = vshrl.u32 %v900_v2, 16 }
 0x39f   : > { %v908_v8 = vpack.i.b16 %v907_v7, %v906_v6  ;;  %v912_v9 = vpack.i.b16 %v901_v3, %v876_v0  ;;  %v915_v11 = vshrl.u32 %v901_v3, 16  ;;  %918 = vst.msk [vmem:[#allocation3] sm:$0xf] %vm732_vm2, %v904_v4  ;;  %v2499_v6 = vld [vmem:[%s3261_s8] sm:$0xff]  }
 0x3a1   : > { %v916_v12 = vpack.i.b16 %v915_v11, %v914_v10  ;;  %919 = vst.msk [vmem:[#allocation3 + $0x4] sm:$0xf] %vm732_vm2, %v908_v8  ;;  %920 = vst.msk [vmem:[#allocation3 + $0x8] sm:$0xf] %vm732_vm2, %v912_v9 }
 0x3a3   : > { %921 = vst.msk [vmem:[#allocation3 + $0xc] sm:$0xf] %vm732_vm2, %v916_v12 }
 0x3a6   : > { %v1193_v13 = vld [vmem:[#allocation3] sm:$0xf] }
 0x3a7   : > { %v1427_v14 = vsel %vm1201_vm3, %v1193_v13, 0 }
 0x3a8   : > { %2338 = vmatpush3.bf16.msra.mxu0 %v1427_v14  ;;  %v1194_v16 = vld [vmem:[#allocation3 + $0x4] sm:$0xf]  ;;  %v1195_v49 = vld [vmem:[#allocation3 + $0x8] sm:$0xf] }
 0x3a9   : > { %v1473_v18 = vsel %vm1201_vm3, %v1194_v16, 0  ;;  %2349 = vmatprep.subr.bf16.mxu0 %v2708_v15  ;;  %v1519_v54 = vsel %vm1201_vm3, %v1195_v49, 0 }
 0x3aa   : > { %2344 = vmatpush3.bf16.msra.mxu1 %v1473_v18  ;;  %v1196_v57 = vld [vmem:[#allocation3 + $0xc] sm:$0xf] }
 0x3ab   : > { %2355 = vmatprep.subr.bf16.mxu1 %v2708_v15  ;;  %v1565_v61 = vsel %vm1201_vm3, %v1196_v57, 0 }
 0x405   : > { %v1239_v19 = vpop.f32.mrb[8].mxu1 }
 0x406   : > { %v2317_v20 = vpop.f32.mrb[9].mxu1  ;;  %v1383_v21 = vsel %vm1197_vm4, %v1239_v19, -inf }
 0x407   : > { %1384 = vmax.xlane.f32.xlu0 %v1383_v21  ;;  %v1242_v22 = vpop.f32.mrb[10].mxu1 }
 0x408   : > { %v2318_v23 = vpop.f32.mrb[11].mxu1 }
 0x409   : > { %v1331_v24 = vpop.f32.mrb[0].mxu0 }
 0x40a   : > { %v2329_v25 = vpop.f32.mrb[1].mxu0  ;;  %v1389_v33 = vsel %vm1197_vm4, %v1331_v24, -inf }
 0x40b   : > { %v1334_v26 = vpop.f32.mrb[2].mxu0 }
 0x40c   : > { %v2330_v27 = vpop.f32.mrb[3].mxu0 }
 0x40d   : > { %v1285_v28 = vpop.f32.mrb[12].mxu1 }
 0x40e   : > { %v2323_v29 = vpop.f32.mrb[13].mxu1  ;;  %v1386_v30 = vsel %vm1197_vm4, %v1285_v28, -inf }
 0x40f   : > { %1387 = vmax.xlane.f32.xlu1 %v1386_v30  ;;  %v1288_v31 = vpop.f32.mrb[14].mxu1 }
 0x410   : > { %v2324_v32 = vpop.f32.mrb[15].mxu1 }
 0x413   : > { %1390 = vmax.xlane.f32.xlu1 %v1389_v33 }
 0x415   : > { %v1377_v34 = vpop.f32.mrb[16].mxu1 }
 0x416   : > { %v2335_v35 = vpop.f32.mrb[17].mxu1  ;;  %v1392_v36 = vsel %vm1197_vm4, %v1377_v34, -inf }
 0x417   : > { %1393 = vmax.xlane.f32.xlu1 %v1392_v36  ;;  %v1380_v37 = vpop.f32.mrb[18].mxu1 }
 0x418   : > { %v2336_v38 = vpop.f32.mrb[19].mxu1 }
 0x494   : > { %v1385_v39 = vpop.xlane.xlu0 %1384 }
 0x495   : > { %v1395_v40 = vsub.f32 %v1239_v19, %v1385_v39 }
 0x497   : > { %v1399_v41 = vmul.f32 1.442695, %v1395_v40 }
 0x499   : > { %2515 = vpow2.f32 %v1399_v41 }
 0x49c   : > { %v1388_v42 = vpop.xlane.xlu1 %1387 }
 0x49d   : > { %v1396_v43 = vsub.f32 %v1285_v28, %v1388_v42 }
 0x49f   : > { %v1401_v44 = vmul.f32 1.442695, %v1396_v43 }
 0x4a0   : > { %v1391_v45 = vpop.xlane.xlu1 %1390 }
 0x4a1   : > { %2517 = vpow2.f32 %v1401_v44  ;;  %v1397_v46 = vsub.f32 %v1331_v24, %v1391_v45 }
 0x4a3   : > { %v2516_v47 = vpop.eup %2515  ;;  %v1403_v48 = vmul.f32 1.442695, %v1397_v46 }
 0x4a4   : > { %v1394_v50 = vpop.xlane.xlu1 %1393  ;;  %v1407_v51 = vsel %vm1197_vm4, %v2516_v47, 0.0  ;;  %v1419_v52 = vpack.c.bf16 %v2516_v47, %v2516_v47 }
 0x4a5   : > { %2519 = vpow2.f32 %v1403_v48  ;;  %v1398_v53 = vsub.f32 %v1377_v34, %v1394_v50  ;;  %1408 = vadd.xlane.f32.xlu0 %v1407_v51 }
 0x4a6   : > { %2340 = vmatmul.mubr.msk.bf16.vlgmr.msra.gmra.mrb[4].mxu0 %vm1197_vm4, %v1419_v52 }
 0x4a7   : > { %v1405_v55 = vmul.f32 1.442695, %v1398_v53  ;;  %2350 = vmatpush3.bf16.msra.mxu0 %v1519_v54  ;;  %2351 = vmatprep.mubr.msk.bf16.mxu0 %vm2709_vm1, %v2708_v15 }
 0x4a8   : > { %2361 = vmatprep.subr.bf16.mxu0 %v2708_v15 }
 0x4a9   : > { %2521 = vpow2.f32 %v1405_v55 }
 0x4ab   : > { %v2518_v56 = vpop.eup %2517 }
 0x4ac   : > { %v1410_v58 = vsel %vm1197_vm4, %v2518_v56, 0.0  ;;  %v1420_v60 = vpack.c.bf16 %v2518_v56, %v2518_v56 }
 0x4ad   : > { %1411 = vadd.xlane.f32.xlu1 %v1410_v58 }
 0x4ae   : > { %2346 = vmatmul.mubr.msk.bf16.vlgmr.msra.gmra.mrb[20].mxu1 %vm1197_vm4, %v1420_v60 }
 0x4af   : > { %v2520_v62 = vpop.eup %2519  ;;  %2356 = vmatpush3.bf16.msra.mxu1 %v1565_v61  ;;  %2357 = vmatprep.mubr.msk.bf16.mxu1 %vm2709_vm1, %v2708_v15 }
 0x4b0   : > { %v1413_v63 = vsel %vm1197_vm4, %v2520_v62, 0.0  ;;  %v1421_v0 = vpack.c.bf16 %v2520_v62, %v2520_v62  ;;  %2369 = vmatprep.subr.bf16.mxu1 %v2708_v15 }
 0x4b1   : > { %1414 = vadd.xlane.f32.xlu0 %v1413_v63 }
 0x4b2   : > { %2352 = vmatmul.mubr.msk.bf16.vlgmr.msra.gmra.mrb[8].mxu0 %vm1197_vm4, %v1421_v0 }
 0x4b3   : > { %v2522_v2 = vpop.eup %2521  ;;  %2365 = vmatprep.mubr.msk.bf16.mxu0 %vm2709_vm1, %v2708_v15  ;;  %2362 = vmatpush3.bf16.msra.mxu0 %v2499_v6 }
 0x4b4   : > { %v1416_v3 = vsel %vm1197_vm4, %v2522_v2, 0.0  ;;  %v1422_v4 = vpack.c.bf16 %v2522_v2, %v2522_v2  ;;  %2363 = vmatprep.subr.bf16.mxu0 %v2708_v15 }
 0x4b5   : > { %1417 = vadd.xlane.f32.xlu1 %v1416_v3 }
 0x4b6   : > { %2358 = vmatmul.mubr.msk.bf16.vlgmr.msra.gmra.mrb[24].mxu1 %vm1197_vm4, %v1422_v4 }
 0x4b7   : > { %2373 = vmatprep.mubr.msk.bf16.mxu1 %vm2709_vm1, %v2708_v15 }
 0x532   : > { %v1409_v7 = vpop.xlane.xlu0 %1408 }
 0x533   : > { %2523 = vrcp.f32 %v1409_v7 }
 0x53a   : > { %v1412_v8 = vpop.xlane.xlu1 %1411 }
 0x53d   : > { %v2524_v16 = vpop.eup %2523 }
 0x53e   : > { %v1415_v9 = vpop.xlane.xlu0 %1414 }
 0x53f   : > { %2525 = vrcp.f32 %v1415_v9 }
 0x540   : > { %2527 = vrcp.f32 %v1412_v8 }
 0x542   : > { %v1418_v13 = vpop.xlane.xlu1 %1417 }
 0x543   : > { %2529 = vrcp.f32 %v1418_v13 }
 0x549   : > { %v2526_v23 = vpop.eup %2525 }
 0x54a   : > { %v2528_v25 = vpop.eup %2527 }
 0x54d   : > { %v2530_v33 = vpop.eup %2529 }
 0x579   : > { %v1463_v10 = vpop.f32.mrb[4].mxu0 }
 0x57a   : > { %v2341_v11 = vpop.f32.mrb[5].mxu0  ;;  %v1611_v19 = vmul.f32 %v2524_v16, %v1463_v10 }
 0x57b   : > { %v1466_v12 = vpop.f32.mrb[6].mxu0 }
 0x57c   : > { %v2342_v14 = vpop.f32.mrb[7].mxu0  ;;  %v1615_v26 = vpack.c.bf16 %v1611_v19, %v1611_v19  ;;  %v2500_v19 = vld [vmem:[%s3261_s8 + $0x8] sm:$0xff]  }
 0x57d   : > { %2364 = vmatpush3.bf16.msra.mxu0 %v2500_v19 }
 0x57e   : > { %v1622_v35 = vrot.slane %v1615_v26, %v3006_v59  ;;  %2377 = vmatprep.subr.bf16.mxu0 %v2708_v15 }
 0x581   : > { %v1509_v18 = vpop.f32.mrb[20].mxu1 }
 0x582   : > { %v2347_v20 = vpop.f32.mrb[21].mxu1  ;;  %v1612_v29 = vmul.f32 %v2528_v25, %v1509_v18 }
 0x583   : > { %v1512_v21 = vpop.f32.mrb[22].mxu1 }
 0x584   : > { %v2348_v22 = vpop.f32.mrb[23].mxu1  ;;  %v1649_v39 = vpack.c.bf16 %v1612_v29, %v1612_v29 }
 0x585   : > { %v1555_v24 = vpop.f32.mrb[8].mxu0 }
 0x586   : > { %v1613_v27 = vmul.f32 %v2526_v23, %v1555_v24  ;;  %v2353_v28 = vpop.f32.mrb[9].mxu0  ;;  %v1656_v47 = vrot.slane %v1649_v39, %v3006_v59 }
 0x587   : > { %v1558_v30 = vpop.f32.mrb[10].mxu0 }
 0x588   : > { %v1623_v31 = vpack.c.bf16 %v1613_v27, %v1613_v27  ;;  %v2354_v32 = vpop.f32.mrb[11].mxu0 }
 0x589   : > { %v1601_v34 = vpop.f32.mrb[24].mxu1 }
 0x58a   : > { %v1630_v36 = vrot.slane %v1623_v31, %v3006_v59  ;;  %v1614_v37 = vmul.f32 %v2530_v33, %v1601_v34  ;;  %v2359_v38 = vpop.f32.mrb[25].mxu1 }
 0x58b   : > { %v1604_v40 = vpop.f32.mrb[26].mxu1 }
 0x58c   : > { %v1631_v41 = vcombine.low %v1622_v35, %v1630_v36  ;;  %v1632_v42 = vcombine.high %v1622_v35, %v1630_v36  ;;  %v1657_v43 = vpack.c.bf16 %v1614_v37, %v1614_v37  ;;  %v2360_v44 = vpop.f32.mrb[27].mxu1  ;;  %v2235_v40 = vld [vmem:[#allocation9] ss:$0 sm:$0xff] }
 0x58e   : > { %v1639_v45 = vrot.slane %v1631_v41, %v3012_v5  ;;  %v1664_v46 = vrot.slane %v1657_v43, %v3006_v59  ;;  %v1646_v48 = vrot.slane %v1632_v42, %v3012_v5 }
 0x590   : > { %v1665_v49 = vcombine.low %v1656_v47, %v1664_v46  ;;  %v1666_v50 = vcombine.high %v1656_v47, %v1664_v46  ;;  %v1647_v51 = vcombine.high %v1639_v45, %v2716_v17  ;;  %v1648_v54 = vcombine.high %v1646_v48, %v2716_v17 }
 0x591   : > { %v1687_v55 = vshrl.u32 %v1639_v45, 16  ;;  %v1703_v62 = vshrl.u32 %v1646_v48, 16 }
 0x592   : > { %v1673_v52 = vrot.slane %v1665_v49, %v3012_v5  ;;  %v1680_v53 = vrot.slane %v1666_v50, %v3012_v5  ;;  %v1695_v61 = vshrl.u32 %v1647_v51, 16  ;;  %v1711_v7 = vshrl.u32 %v1648_v54, 16 }
 0x594   : > { %v1681_v56 = vcombine.high %v1673_v52, %v2716_v17  ;;  %v1682_v57 = vcombine.high %v1680_v53, %v2716_v17  ;;  %v1685_v58 = vpack.i.b16 %v1673_v52, %v1639_v45  ;;  %v1688_v60 = vshrl.u32 %v1673_v52, 16 }
 0x595   : > { %v1701_v63 = vpack.i.b16 %v1680_v53, %v1646_v48  ;;  %v1704_v0 = vshrl.u32 %v1680_v53, 16  ;;  %v2501_v53 = vld [vmem:[%s3265_s12] sm:$0xff]  }
 0x596   : > { %v1689_v2 = vpack.i.b16 %v1688_v60, %v1687_v55  ;;  %v1693_v3 = vpack.i.b16 %v1681_v56, %v1647_v51  ;;  %v1696_v4 = vshrl.u32 %v1681_v56, 16  ;;  %v1709_v6 = vpack.i.b16 %v1682_v57, %v1648_v54  ;;  %2370 = vmatpush3.bf16.msra.mxu1 %v2501_v53  ;;  %v2503_v54 = vld [vmem:[%s3267_s14] sm:$0xff]   ;;  %v2504_v55 = vld [vmem:[%s3267_s14 + $0x8] sm:$0xff]   ;;  %v2505_v56 = vld [vmem:[%s3267_s14 + $0x10] sm:$0xff]  }
 0x597   : > { %v1705_v8 = vpack.i.b16 %v1704_v0, %v1703_v62  ;;  %v1712_v9 = vshrl.u32 %v1682_v57, 16  ;;  %v1715_v10 = vcombine.low %v1685_v58, %v1701_v63  ;;  %2371 = vmatprep.subr.bf16.mxu1 %v2708_v15  ;;  %v2506_v57 = vld [vmem:[%s3267_s14 + $0x18] sm:$0xff]   ;;  %v2507_v58 = vld [vmem:[%s3267_s14 + $0x20] sm:$0xff]   ;;  %v2508_v60 = vld [vmem:[%s3267_s14 + $0x28] sm:$0xff]  }
 0x598   : > { %v1697_v11 = vpack.i.b16 %v1696_v4, %v1695_v61  ;;  %v1723_v12 = vcombine.low %v1693_v3, %v1709_v6  ;;  %v2240_v4 = vld [vmem:[%s3264_s11] ss:$0 sm:$0xff] }
 0x599   : > { %v1713_v13 = vpack.i.b16 %v1712_v9, %v1711_v7  ;;  %v1740_v14 = vcombine.low %v1689_v2, %v1705_v8  ;;  %v1722_v16 = vrot.slane %v1715_v10, %v3006_v59  ;;  %v2239_v2 = vld [vmem:[%s3263_s10] ss:$0 sm:$0xff]  ;;  %v2509_v9 = vld [vmem:[%s3267_s14 + $0x30] sm:$0xff]   ;;  %v2510_v10 = vld [vmem:[%s3267_s14 + $0x38] sm:$0xff]  }
 0x59a   : > { %v1730_v18 = vrot.slane %v1723_v12, %v3006_v59 }
 0x59b   : > { %v1748_v20 = vcombine.low %v1697_v11, %v1713_v13  ;;  %v1747_v22 = vrot.slane %v1740_v14, %v3006_v59  ;;  %v2241_v11 = vld [vmem:[%s3266_s13] ss:$0 sm:$0xff] }
 0x59c   : > { %v1731_v21 = vcombine.low %v1722_v16, %v1730_v18 }
 0x59d   : > { %v1755_v23 = vrot.slane %v1748_v20, %v3006_v59 }
 0x59e   : > { %v1738_v24 = vrot.slane %v1731_v21, %v3012_v5 }
 0x59f   : > { %v1756_v25 = vcombine.low %v1747_v22, %v1755_v23 }
 0x5a0   : > { %v1739_v27 = vcombine.high %v1738_v24, %v2716_v17  ;;  %v1768_v28 = vshrl.u32 %v1738_v24, 16 }
 0x5a1   : > { %v1763_v26 = vrot.slane %v1756_v25, %v3012_v5 }
 0x5a2   : > { %v1774_v34 = vshrl.u32 %v1739_v27, 16 }
 0x5a3   : > { %v1769_v29 = vshrl.u32 %v1763_v26, 16  ;;  %v1764_v30 = vcombine.high %v1763_v26, %v2716_v17  ;;  %v1767_v31 = vpack.i.b16 %v1763_v26, %v1738_v24 }
 0x5a5   : > { %v1770_v32 = vpack.i.b16 %v1769_v29, %v1768_v28  ;;  %v1773_v33 = vpack.i.b16 %v1764_v30, %v1739_v27  ;;  %v1775_v35 = vshrl.u32 %v1764_v30, 16 }
 0x5a7   : > { %1777 = vrot.lane.b32.xlu0 %v1770_v32, %s2717_s0  ;;  %1779 = vrot.lane.b32.xlu1 %v1773_v33, %s2718_s18  ;;  %v1776_v59 = vpack.i.b16 %v1775_v35, %v1774_v34  ;;  %s3306_s18 = sld [smem:[#allocation24_spill]] }
 0x5ab   : > { %1781 = vrot.lane.b32.xlu1 %v1776_v59, %s2719_s27  ;;  %s3307_s27 = sld [smem:[#allocation19_spill]] }
 0x5b1   : > { %p3310_p4 = scmp.ne.s32.totalorder %s3307_s27, 0 }
 0x5b3   : > { %p2619_p8 = pnand %p2618_p13, %p3310_p4 }
 0x5b5   : > { %p2620_p10 = pneg %p2619_p8 }
 0x5b7   : > { %p2627_p6 = pnand %p2626_p5, %p2620_p10 }
 0x619   : > { %v1778_v36 = vpop.permute.xlu0 %1777  ;;  %v1780_v5 = vpop.permute.xlu1 %1779 }
 0x61a   : > { %v1785_v37 = vsel %vm1197_vm4, %v1767_v31, %v1778_v36 }
 0x61b   : > { %v1788_v38 = vsel %vm1786_vm5, %v1785_v37, %v1780_v5 }
 0x61d   : > { %v1782_v17 = vpop.permute.xlu1 %1781 }
 0x61e   : > { %v1791_v39 = vsel %vm1789_vm6, %v1788_v38, %v1782_v17 }
 0x61f   : > { %2366 = vmatmul.mubr.msk.bf16.vlgmr.msra.gmra.mrb[12].mxu0 %vm605_vm0, %v1791_v39 }
 0x620   : > { %2393 = vmatprep.mubr.msk.bf16.mxu0 %vm2709_vm1, %v2708_v15  ;;  %2378 = vmatpush3.bf16.msra.mxu0 %v2503_v54 }
 0x621   : > { %2379 = vmatprep.subr.bf16.mxu0 %v2708_v15 }
 0x624   : > { %2380 = vmatpush3.bf16.msra.mxu0 %v2504_v55 }
 0x625   : > { %2381 = vmatprep.subr.bf16.mxu0 %v2708_v15 }
 0x628   : > { %2382 = vmatpush3.bf16.msra.mxu0 %v2505_v56 }
 0x629   : > { %2383 = vmatprep.subr.bf16.mxu0 %v2708_v15 }
 0x62c   : > { %2384 = vmatpush3.bf16.msra.mxu0 %v2506_v57 }
 0x62d   : > { %2385 = vmatprep.subr.bf16.mxu0 %v2708_v15 }
 0x630   : > { %2386 = vmatpush3.bf16.msra.mxu0 %v2507_v58 }
 0x631   : > { %2387 = vmatprep.subr.bf16.mxu0 %v2708_v15 }
 0x634   : > { %2388 = vmatpush3.bf16.msra.mxu0 %v2508_v60 }
 0x635   : > { %2389 = vmatprep.subr.bf16.mxu0 %v2708_v15 }
 0x638   : > { %2390 = vmatpush3.bf16.msra.mxu0 %v2509_v9 }
 0x639   : > { %2391 = vmatprep.subr.bf16.mxu0 %v2708_v15  ;;  %v2245_v15 = vld [vmem:[%s3306_s18] ss:$0 sm:$0xff] }
 0x63c   : > { %2392 = vmatpush3.bf16.msra.mxu0 %v2510_v10 }
 0x6f2   : > { %v1851_v41 = vpop.f32.mrb[12].mxu0 }
 0x6f3   : > { %v1852_v42 = vadd.f32 %v2235_v40, %v1851_v41  ;;  %v2367_v43 = vpop.f32.mrb[13].mxu0 }
 0x6f4   : > { %v1854_v44 = vpop.f32.mrb[14].mxu0 }
 0x6f5   : > { %v3142_v45 = vadd.f32 %v1852_v42, %v2963_v1  ;;  %v2368_v46 = vpop.f32.mrb[15].mxu0  ;;  %v2502_v1 = vld [vmem:[%s3265_s12 + $0x8] sm:$0xff]  }
 0x6f6   : > { %2372 = vmatpush3.bf16.msra.mxu1 %v2502_v1 }
 0x6f7   : > { %v1860_v47 = vsel %vm605_vm0, %v3142_v45, 0.0 }
 0x6f8   : > { %1861 = vadd.xlane.f32.xlu1 %v1860_v47 }
 0x785   : > { %v1862_v48 = vpop.xlane.xlu1 %1861 }
 0x786   : > { %v1863_v49 = vmul.f32 0.03125, %v1862_v48 }
 0x788   : > { %v1864_v50 = vsub.f32 %v3142_v45, %v1863_v49 }
 0x78a   : > { %v1865_v51 = vmul.f32 %v1864_v50, %v1864_v50 }
 0x78c   : > { %v1866_v52 = vsel %vm605_vm0, %v1865_v51, 0.0 }
 0x78d   : > { %1867 = vadd.xlane.f32.xlu0 %v1866_v52 }
 0x81a   : > { %v1868_v61 = vpop.xlane.xlu0 %1867 }
 0x81b   : > { %v1869_v62 = vmul.f32 0.03125, %v1868_v61 }
 0x81d   : > { %v1870_v63 = vadd.f32 1e-05, %v1869_v62 }
 0x81f   : > { %2531 = vrsqrt.f32 %v1870_v63 }
 0x829   : > { %v2532_v0 = vpop.eup %2531 }
 0x82a   : > { %v1872_v3 = vmul.f32 %v2532_v0, %v1864_v50 }
 0x82c   : > { %v1879_v6 = vmul.f32 %v2239_v2, %v1872_v3 }
 0x82e   : > { %v1886_v7 = vadd.f32 %v2240_v4, %v1879_v6 }
 0x830   : > { %v1887_v8 = vpack.c.bf16 %v1886_v7, %v1886_v7 }
 0x832   : > { %2374 = vmatmul.mubr.msk.bf16.vlgmr.msra.gmra.mrb[28].mxu1 %vm605_vm0, %v1887_v8 }
 0x905   : > { %v1948_v12 = vpop.f32.mrb[28].mxu1 }
 0x906   : > { %v1949_v13 = vadd.f32 %v2241_v11, %v1948_v12  ;;  %v2375_v14 = vpop.f32.mrb[29].mxu1 }
 0x907   : > { %v1951_v16 = vpop.f32.mrb[30].mxu1 }
 0x908   : > { %v1954_v18 = vmax.f32 %v1949_v13, 0.0  ;;  %v2376_v19 = vpop.f32.mrb[31].mxu1 }
 0x90a   : > { %v1955_v20 = vpack.c.bf16 %v1954_v18, %v1954_v18 }
 0x90c   : > { %2394 = vmatmul.mubr.bf16.vlgmr.msra.gmra.mrb[16].mxu0 %v1955_v20 }
 0x9df   : > { %v2061_v21 = vpop.f32.mrb[16].mxu0 }
 0x9e0   : > { %v2062_v22 = vadd.f32 %v2245_v15, %v2061_v21  ;;  %v2395_v23 = vpop.f32.mrb[17].mxu0 }
 0x9e1   : > { %v2064_v24 = vpop.f32.mrb[18].mxu0 }
 0x9e2   : > { %v2067_v25 = vadd.f32 %v2062_v22, %v3142_v45  ;;  %v2396_v26 = vpop.f32.mrb[19].mxu0 }
 0x9e4   : > { %2068 = vst.msk [vmem:[%s585_s29] sm:$0xff] %vm605_vm0, %v2067_v25 }
 0x9e5   : > { %2630 = shalt.err (!%p2627_p6)
}
 0x9e6   : > { %s2631_s17 = scalar_lea.hbm %s3205_s19, 128  ;;  %s2635_s7 = scalar_lea.hbm %s3309_s30, 256 }
 0x9e7   : > { %p2632_p7 = scmp.ne.s32.totalorder %s3205_s19, %s2631_s17  ;;  %p2636_p0 = scmp.lt.u32.totalorder %s3205_s19, %s3309_s30 }
 0x9e8   : > { %p2637_p2 = scmp.lt.u32.totalorder %s2635_s7, %s2631_s17  ;;  %p2639_p13 = scmp.lt.u32.totalorder %s2631_s17, %s3205_s19 }
 0x9e9   : > { %p2633_p9 = pnand %p2632_p7, %p3310_p4 }
 0x9ea   : > { %p2638_p1 = por %p2637_p2, %p2636_p0 }
 0x9eb   : > { %p2634_p12 = pneg %p2633_p9 }
 0x9ec   : > { %p2640_p8 = por %p2639_p13, %p2638_p1 }
 0x9ee   : > { %p2641_p10 = pnand %p2640_p8, %p2634_p12 }
 0x9f0   : > { %2644 = shalt.err (!%p2641_p10)
}
 0x9f1   : > { %2409 = dma.vmem_to_hbm [thread:$0]  (%p3310_p4), %s3207_s28, 128, %s3205_s19, %s2070_s24  }
 0x9f2 PF: > { %s3311_s16 = sld [smem:[#allocation17_spill]]  ;;  %s3312_s23 = sld [smem:[#allocation14_spill]] }
 0x9f3   : > { %s3313_s26 = sld [smem:[#allocation20_spill]] }
 0x9f8   : > { %p2431_p11 = scmp.ge.s32.totalorder %s3311_s16, 2  ;;  %s2096_s21 = sand.u32 1, %s3312_s23  }
 0x9f9   : > { %p3314_p3 = scmp.ne.s32.totalorder %s3313_s26, 0  ;;  %s2097_s15 = scalar_lea.sflag [#allocation6], %s2096_s21 }
 0x9fb   : > { %p2422_p5 = pnand %p2431_p11, %p3314_p3 }
 0x9fd   : > { %2678 = dma.done.wait (!%p2422_p5), %s2097_s15, 128  }
 0x9fe   : > { %2680 = vsyncadd (!%p2422_p5), %s2097_s15, 4294967168  ;;  %s31_s26 = sadd.s32 1, %s3311_s16   ;;  %s3315_s25 = sld [smem:[#allocation15_spill]] }
 0x9ff   : > { %p28_p6 = scmp.ge.s32.totalorder %s31_s26, 4   ;;  %s3316_s23 = sld [smem:[#allocation21_spill]] }
 0xa00   : > { %s3317_s24 = sld [smem:[#allocation16_spill]]  ;;  %s3318_s27 = sld [smem:[#allocation18_spill]] }
 0xa01   : > { %s3319_s21 = smov %s2687_s22  ;;  %30 = sbr.rel (!%p28_p6) target bundleno = 11 (0xb), region = 139 }
 0xa04   : > { %s3320_s22 = smov %s3315_s25 }
 0xa06   : > { %s3321_s25 = smov %s3318_s27 }
 0xa08   :  { %2102 = vsyncpa [#allocation5], 1 }
 0xa09   :  { %2104 = vsyncpa [#allocation5 + $0x1], 1 }
 0xa0a   :  { %2105 = vsyncpa [#allocation8], 1 }
 0xa0b   :  { %2106 = vsyncpa [#allocation6], 1 }
 0xa0c   :  { %2108 = vsyncpa [#allocation6 + $0x1], 1 }

</bundles_post_ra>
